<compile_context>
chip_gen: v5e
topology: v5e:2x2
jax: 0.10.0
libtpu: 0.0.40
codegen_flags: <defaults>
</compile_context>

<pallas_src>
import math
from functools import partial

import jax
import jax.numpy as jnp
from jax import lax
from jax.experimental import pallas as pl
from jax.experimental.pallas import tpu as pltpu

LN_EPS = 1e-6
COMPUTE_DTYPE = jnp.bfloat16          # MXU operands / activations
_INV_SQRT2 = 1.0 / math.sqrt(2.0)


# --------------------------------------------------------------------------
# tiling helpers (work both at tiny test shapes and real ViT shapes)
# --------------------------------------------------------------------------
def _row_tile(m, target=256):
    return m if m <= target else target


def _col_tile(n, target=512):
    return n if n <= target else target


def _k_tile(k, target=512):
    """Contraction tile: must divide K exactly (padding a K tile is unsafe)."""
    if k <= target:
        return k
    t = target - target % 128
    while t >= 128:
        if k % t == 0:
            return t
        t -= 128
    return k                                  # no aligned divisor -> untiled K


def _erf_f32(z):
    # Abramowitz & Stegun 7.1.26, |err| <= 1.5e-7 (<< bf16 eps); uses only
    # exp / mul / add / where so it always lowers on the VPU/EUP.
    a1, a2, a3, a4, a5 = (0.254829592, -0.284496736, 1.421413741,
                          -1.453152027, 1.061405429)
    p = 0.3275911
    za = jnp.abs(z)
    t = 1.0 / (1.0 + p * za)
    poly = ((((a5 * t + a4) * t + a3) * t + a2) * t + a1) * t
    y = 1.0 - poly * jnp.exp(-za * za)
    return jnp.where(z >= 0, y, -y)


def _gelu_f32(x):
    # exact (erf-based) GELU, matching nn.GELU() default.
    return 0.5 * x * (1.0 + _erf_f32(x * _INV_SQRT2))


# --------------------------------------------------------------------------
# fused residual-add + LayerNorm + matmul (+ optional GELU epilogue)
# --------------------------------------------------------------------------
def _add_ln_matmul_kernel(x_ref, res_ref, g_ref, b_ref, w_ref, bias_ref,
                          res_out_ref, y_ref, *, apply_gelu):
    x = x_ref[...].astype(jnp.float32)
    r = res_ref[...].astype(jnp.float32)
    s = x + r                                            # fp32 residual stream
    res_out_ref[...] = s                                 # revisited across N axis
    mean = jnp.mean(s, axis=-1, keepdims=True)
    var = jnp.mean((s - mean) ** 2, axis=-1, keepdims=True)
    normed = (s - mean) * lax.rsqrt(var + LN_EPS)
    normed = normed * g_ref[...].astype(jnp.float32) + b_ref[...].astype(jnp.float32)
    acc = jnp.dot(normed.astype(w_ref.dtype), w_ref[...],
                  preferred_element_type=jnp.float32)
    acc = acc + bias_ref[...].astype(jnp.float32)
    if apply_gelu:
        acc = _gelu_f32(acc)
    y_ref[...] = acc.astype(y_ref.dtype)


def add_ln_linear(x, residual, gamma, beta, w, b, *, apply_gelu=False,
                  out_dtype=COMPUTE_DTYPE):
    """Returns (new_residual_fp32, (LN(x+residual) @ w + b) [GELU])."""
    m, d = x.shape
    d2, n = w.shape
    assert d2 == d
    tm, tn = _row_tile(m), _col_tile(n)
    grid = (pl.cdiv(m, tm), pl.cdiv(n, tn))
    cost = pl.CostEstimate(
        flops=int(2 * m * n * d + 10 * m * d),
        transcendentals=int(m * n if apply_gelu else 0),
        bytes_accessed=int(x.size * x.dtype.itemsize + residual.size * 4
                           + w.size * w.dtype.itemsize + m * d * 4
                           + m * n * jnp.dtype(out_dtype).itemsize))
    res_out, y = pl.pallas_call(
        partial(_add_ln_matmul_kernel, apply_gelu=apply_gelu),
        out_shape=(jax.ShapeDtypeStruct((m, d), jnp.float32),
                   jax.ShapeDtypeStruct((m, n), out_dtype)),
        grid=grid,
        in_specs=[pl.BlockSpec((tm, d), lambda i, j: (i, 0)),
                  pl.BlockSpec((tm, d), lambda i, j: (i, 0)),
                  pl.BlockSpec((1, d), lambda i, j: (0, 0)),
                  pl.BlockSpec((1, d), lambda i, j: (0, 0)),
                  pl.BlockSpec((d, tn), lambda i, j: (0, j)),
                  pl.BlockSpec((1, tn), lambda i, j: (0, j))],
        out_specs=(pl.BlockSpec((tm, d), lambda i, j: (i, 0)),
                   pl.BlockSpec((tm, tn), lambda i, j: (i, j))),
        compiler_params=pltpu.CompilerParams(
            dimension_semantics=("parallel", "arbitrary")),
        cost_estimate=cost,
    )(x, residual, gamma.reshape(1, d), beta.reshape(1, d), w, b.reshape(1, n))
    return res_out, y


# --------------------------------------------------------------------------
# tiled linear (M x N x K grid, f32 VMEM accumulator, optional GELU epilogue)
# --------------------------------------------------------------------------
def _linear_kernel(x_ref, w_ref, b_ref, o_ref, acc_ref, *, apply_gelu):
    @pl.when(pl.program_id(2) == 0)
    def _():
        acc_ref[...] = jnp.zeros_like(acc_ref)

    acc_ref[...] += jnp.dot(x_ref[...], w_ref[...],
                            preferred_element_type=jnp.float32)

    @pl.when(pl.program_id(2) == pl.num_programs(2) - 1)
    def _():
        acc = acc_ref[...] + b_ref[...].astype(jnp.float32)
        if apply_gelu:
            acc = _gelu_f32(acc)
        o_ref[...] = acc.astype(o_ref.dtype)


def linear(x, w, b, *, apply_gelu=False, out_dtype=COMPUTE_DTYPE):
    m, k = x.shape
    k2, n = w.shape
    assert k2 == k
    tm, tn, tk = _row_tile(m), _col_tile(n), _k_tile(k)
    grid = (pl.cdiv(m, tm), pl.cdiv(n, tn), k // tk)
    cost = pl.CostEstimate(
        flops=int(2 * m * n * k),
        transcendentals=int(m * n if apply_gelu else 0),
        bytes_accessed=int(x.size * x.dtype.itemsize + w.size * w.dtype.itemsize
                           + n * 4 + m * n * jnp.dtype(out_dtype).itemsize))
    return pl.pallas_call(
        partial(_linear_kernel, apply_gelu=apply_gelu),
        out_shape=jax.ShapeDtypeStruct((m, n), out_dtype),
        grid=grid,
        in_specs=[pl.BlockSpec((tm, tk), lambda i, j, kk: (i, kk)),
                  pl.BlockSpec((tk, tn), lambda i, j, kk: (kk, j)),
                  pl.BlockSpec((1, tn), lambda i, j, kk: (0, j))],
        out_specs=pl.BlockSpec((tm, tn), lambda i, j, kk: (i, j)),
        scratch_shapes=[pltpu.VMEM((tm, tn), jnp.float32)],
        compiler_params=pltpu.CompilerParams(
            dimension_semantics=("parallel", "parallel", "arbitrary")),
        cost_estimate=cost,
    )(x, w, b.reshape(1, n))


# --------------------------------------------------------------------------
# multi-head attention on packed (B, S, 3D) QKV — no XLA-side transposes
# --------------------------------------------------------------------------
def _attn_kernel(qkv_ref, o_ref, *, num_heads, head_dim, scale):
    d = num_heads * head_dim
    outs = []
    for h in range(num_heads):                      # static unroll over heads
        q = qkv_ref[0, :, h * head_dim:(h + 1) * head_dim]
        k = qkv_ref[0, :, d + h * head_dim:d + (h + 1) * head_dim]
        v = qkv_ref[0, :, 2 * d + h * head_dim:2 * d + (h + 1) * head_dim]
        # NT matmul: contract last dim of q and k directly (no in-kernel k.T)
        s = lax.dot_general(q, k, (((1,), (1,)), ((), ())),
                            preferred_element_type=jnp.float32) * scale
        s = s - jnp.max(s, axis=-1, keepdims=True)
        p = jnp.exp(s)
        p = p * pl.reciprocal(jnp.sum(p, axis=-1, keepdims=True), approx=True)
        outs.append(jnp.dot(p.astype(v.dtype), v,
                            preferred_element_type=jnp.float32))
    # single lane-dense (S, D) store
    o_ref[0] = jnp.concatenate(outs, axis=-1).astype(o_ref.dtype)


def mha_attention(qkv, num_heads, out_dtype=COMPUTE_DTYPE):
    """qkv: (B, S, 3*D) packed as [q | k | v], each laid out '(h d)'."""
    bsz, seq, three_d = qkv.shape
    d = three_d // 3
    dh = d // num_heads
    scale = 1.0 / math.sqrt(dh)
    cost = pl.CostEstimate(
        flops=int(4 * bsz * num_heads * seq * seq * dh),
        transcendentals=int(bsz * num_heads * seq * seq),
        bytes_accessed=int(qkv.size * qkv.dtype.itemsize
                           + bsz * seq * d * jnp.dtype(out_dtype).itemsize))
    # TODO(synk): for S >> ViT-scale convert to an online-softmax (flash) loop
    # over K/V tiles; one-shot softmax is exact and cheapest at S ~ 200.
    return pl.pallas_call(
        partial(_attn_kernel, num_heads=num_heads, head_dim=dh, scale=scale),
        out_shape=jax.ShapeDtypeStruct((bsz, seq, d), out_dtype),
        grid=(bsz,),
        in_specs=[pl.BlockSpec((1, seq, three_d), lambda b: (b, 0, 0))],
        out_specs=pl.BlockSpec((1, seq, d), lambda b: (b, 0, 0)),
        compiler_params=pltpu.CompilerParams(dimension_semantics=("parallel",)),
        cost_estimate=cost,
    )(qkv)


# --------------------------------------------------------------------------
# standalone residual-add + LayerNorm (final norm only)
# --------------------------------------------------------------------------
def _add_ln_kernel(x_ref, res_ref, g_ref, b_ref, y_ref):
    x = x_ref[...].astype(jnp.float32)
    r = res_ref[...].astype(jnp.float32)
    s = x + r
    mean = jnp.mean(s, axis=-1, keepdims=True)
    var = jnp.mean((s - mean) ** 2, axis=-1, keepdims=True)
    y = (s - mean) * lax.rsqrt(var + LN_EPS)
    y_ref[...] = (y * g_ref[...] + b_ref[...]).astype(y_ref.dtype)


def add_layernorm(x, residual, gamma, beta, out_dtype=jnp.float32):
    m, d = x.shape
    tm = _row_tile(m)
    return pl.pallas_call(
        _add_ln_kernel,
        out_shape=jax.ShapeDtypeStruct((m, d), out_dtype),
        grid=(pl.cdiv(m, tm),),
        in_specs=[pl.BlockSpec((tm, d), lambda i: (i, 0)),
                  pl.BlockSpec((tm, d), lambda i: (i, 0)),
                  pl.BlockSpec((1, d), lambda i: (0, 0)),
                  pl.BlockSpec((1, d), lambda i: (0, 0))],
        out_specs=pl.BlockSpec((tm, d), lambda i: (i, 0)),
        compiler_params=pltpu.CompilerParams(dimension_semantics=("parallel",)),
    )(x, residual, gamma.reshape(1, d), beta.reshape(1, d))


# --------------------------------------------------------------------------
# Transformer forward (glue in plain JAX — only free reshapes, no transposes)
# --------------------------------------------------------------------------
def block_forward(bp, hidden, residual, num_heads, mixer_subset_cls):
    bsz, seq, d = hidden.shape
    m = bsz * seq

    # residual add + LN1 fused into the QKV projection (normed never hits HBM)
    residual_f32, qkv = add_ln_linear(
        hidden.reshape(m, d), residual.reshape(m, d),
        bp["ln1_g"], bp["ln1_b"], bp["wqkv"], bp["bqkv"])

    # self-attention; heads sliced in-lane inside the kernel
    ctx = mha_attention(qkv.reshape(bsz, seq, 3 * d), num_heads).reshape(m, d)
    attn_out = linear(ctx, bp["wo"], bp["bo"])

    residual_f32 = residual_f32.reshape(bsz, seq, d)
    if mixer_subset_cls:
        # Block slices the residual to the CLS position (mixer_subset=slice(0,1));
        # the subsequent residual add broadcasts it back over the sequence.
        residual_f32 = jnp.broadcast_to(residual_f32[:, 0:1, :], (bsz, seq, d))

    # residual add + LN2 fused into MLP linear1 + exact-GELU epilogue
    residual2, h = add_ln_linear(
        attn_out, residual_f32.reshape(m, d),
        bp["ln2_g"], bp["ln2_b"], bp["w1"], bp["b1"], apply_gelu=True)

    out = linear(h, bp["w2"], bp["b2"])
    return out.reshape(bsz, seq, d), residual2.reshape(bsz, seq, d)


def transformer_forward(params, x, *, num_heads):
    bsz, length, d = x.shape
    cls = jnp.broadcast_to(params["cls_token"].astype(COMPUTE_DTYPE), (bsz, 1, d))
    hidden = jnp.concatenate([cls, x.astype(COMPUTE_DTYPE)], axis=1)   # (B, S, D)
    seq = length + 1
    residual = jnp.zeros((bsz, seq, d), jnp.float32)   # residual starts as None

    n_blocks = len(params["blocks"])
    for i, bp in enumerate(params["blocks"]):
        hidden, residual = block_forward(bp, hidden, residual, num_heads,
                                         mixer_subset_cls=(i == n_blocks - 1))

    # final: dropout / drop_path identity at eval; add residual + LayerNorm
    m = bsz * seq
    normed = add_layernorm(hidden.reshape(m, d), residual.reshape(m, d),
                           params["norm_g"], params["norm_b"])
    return normed.reshape(bsz, seq, d)[:, 0]           # CLS pooling (pre-logits)


# --------------------------------------------------------------------------
# Deterministic parameter init (matmul weights stored bf16; LN/bias/residual f32)
# --------------------------------------------------------------------------
def init_params(key, embed_dim, depth, mlp_ratio):
    hidden = int(embed_dim * mlp_ratio)
    blocks = []
    for i in range(depth):
        k = jax.random.fold_in(key, i)
        ks = jax.random.split(k, 4)
        blocks.append(dict(
            ln1_g=jnp.ones((embed_dim,), jnp.float32),
            ln1_b=jnp.zeros((embed_dim,), jnp.float32),
            wqkv=(0.02 * jax.random.normal(ks[0], (embed_dim, 3 * embed_dim),
                                           jnp.float32)).astype(COMPUTE_DTYPE),
            bqkv=jnp.zeros((3 * embed_dim,), jnp.float32),
            wo=(0.02 * jax.random.normal(ks[1], (embed_dim, embed_dim),
                                         jnp.float32)).astype(COMPUTE_DTYPE),
            bo=jnp.zeros((embed_dim,), jnp.float32),
            ln2_g=jnp.ones((embed_dim,), jnp.float32),
            ln2_b=jnp.zeros((embed_dim,), jnp.float32),
            w1=(0.02 * jax.random.normal(ks[2], (embed_dim, hidden),
                                         jnp.float32)).astype(COMPUTE_DTYPE),
            b1=jnp.zeros((hidden,), jnp.float32),
            w2=(0.02 * jax.random.normal(ks[3], (hidden, embed_dim),
                                         jnp.float32)).astype(COMPUTE_DTYPE),
            b2=jnp.zeros((embed_dim,), jnp.float32),
        ))
    return dict(
        cls_token=jnp.zeros((1, 1, embed_dim), jnp.float32),   # nn.Parameter(zeros)
        blocks=blocks,
        norm_g=jnp.ones((embed_dim,), jnp.float32),
        norm_b=jnp.zeros((embed_dim,), jnp.float32),
    )


# --------------------------------------------------------------------------
if __name__ == "__main__":
    B, L, D = 2, 8, 32          # batch, signal length, embed_dim
    depth, num_heads, mlp_ratio = 2, 4, 4.0

    key = jax.random.PRNGKey(0)
    pkey, xkey = jax.random.split(key)
    params = init_params(pkey, D, depth, mlp_ratio)
    x = jax.random.normal(xkey, (B, L, D), jnp.float32)

    fwd = jax.jit(partial(transformer_forward, num_heads=num_heads))
    out = jax.block_until_ready(fwd(params, x))
    assert out.shape == (B, D) and out.dtype == jnp.float32
    assert bool(jnp.all(jnp.isfinite(out)))
    print("KERNEL_OK")
</pallas_src>

<mosaic_0001>
module attributes {stable_mosaic.version = 11 : i64} {
  func.func @_add_ln_matmul_kernel(%arg0: i32, %arg1: i32, %arg2: memref<18x32xbf16, #tpu.memory_space<vmem>>, %arg3: memref<18x32xf32, #tpu.memory_space<vmem>>, %arg4: memref<1x32xf32, #tpu.memory_space<vmem>>, %arg5: memref<1x32xf32, #tpu.memory_space<vmem>>, %arg6: memref<32x96xbf16, #tpu.memory_space<vmem>>, %arg7: memref<1x96xf32, #tpu.memory_space<vmem>>, %arg8: memref<18x32xf32, #tpu.memory_space<vmem>>, %arg9: memref<18x96xbf16, #tpu.memory_space<vmem>>) attributes {dimension_semantics = [#tpu.dimension_semantics<parallel>, #tpu.dimension_semantics<arbitrary>], iteration_bounds = array<i64: 1, 1>, scalar_prefetch = 0 : i64, scratch_operands = 0 : i64, tpu.core_type = #tpu.core_type<tc>, window_params = [{transform_indices = @transform_0, window_bounds = array<i64: 18, 32>}, {transform_indices = @transform_1, window_bounds = array<i64: 18, 32>}, {pipeline_mode = #tpu.pipeline_mode<synchronous>, transform_indices = @transform_2, window_bounds = array<i64: 1, 32>}, {pipeline_mode = #tpu.pipeline_mode<synchronous>, transform_indices = @transform_3, window_bounds = array<i64: 1, 32>}, {transform_indices = @transform_4, window_bounds = array<i64: 32, 96>}, {transform_indices = @transform_5, window_bounds = array<i64: 1, 96>}, {transform_indices = @transform_6, window_bounds = array<i64: 18, 32>}, {transform_indices = @transform_7, window_bounds = array<i64: 18, 96>}]} {
    %c0 = arith.constant 0 : index
    %c0_0 = arith.constant 0 : index
    %0 = vector.load %arg2[%c0, %c0_0] : memref<18x32xbf16, #tpu.memory_space<vmem>>, vector<18x32xbf16>
    %1 = arith.extf %0 : vector<18x32xbf16> to vector<18x32xf32>
    %c0_1 = arith.constant 0 : index
    %c0_2 = arith.constant 0 : index
    %2 = vector.load %arg3[%c0_1, %c0_2] : memref<18x32xf32, #tpu.memory_space<vmem>>, vector<18x32xf32>
    %3 = arith.addf %1, %2 : vector<18x32xf32>
    %c0_3 = arith.constant 0 : index
    %c0_4 = arith.constant 0 : index
    %4 = vector.load %arg8[%c0_3, %c0_4] : memref<18x32xf32, #tpu.memory_space<vmem>>, vector<18x32xf32>
    tpu.vector_store %arg8[%c0_3, %c0_4], %3 {strides = array<i32>} : memref<18x32xf32, #tpu.memory_space<vmem>>, vector<18x32xf32>,
    %cst = arith.constant dense<0.000000e+00> : vector<18xf32>
    %5 = vector.multi_reduction <add>, %3, %cst [1] : vector<18x32xf32> to vector<18xf32>
    %6 = vector.shape_cast %5 : vector<18xf32> to vector<18x1xf32>
    %cst_5 = arith.constant 3.200000e+01 : f32
    %7 = vector.broadcast %cst_5 : f32 to vector<18x1xf32>
    %8 = arith.divf %6, %7 : vector<18x1xf32>
    %9 = vector.broadcast %8 : vector<18x1xf32> to vector<18x32xf32>
    %10 = arith.subf %3, %9 : vector<18x32xf32>
    %11 = arith.mulf %10, %10 : vector<18x32xf32>
    %cst_6 = arith.constant dense<0.000000e+00> : vector<18xf32>
    %12 = vector.multi_reduction <add>, %11, %cst_6 [1] : vector<18x32xf32> to vector<18xf32>
    %13 = vector.shape_cast %12 : vector<18xf32> to vector<18x1xf32>
    %cst_7 = arith.constant 3.200000e+01 : f32
    %14 = vector.broadcast %cst_7 : f32 to vector<18x1xf32>
    %15 = arith.divf %13, %14 : vector<18x1xf32>
    %16 = vector.broadcast %8 : vector<18x1xf32> to vector<18x32xf32>
    %17 = arith.subf %3, %16 : vector<18x32xf32>
    %cst_8 = arith.constant 9.99999997E-7 : f32
    %18 = vector.broadcast %cst_8 : f32 to vector<18x1xf32>
    %19 = arith.addf %15, %18 : vector<18x1xf32>
    %20 = math.rsqrt %19 : vector<18x1xf32>
    %21 = vector.broadcast %20 : vector<18x1xf32> to vector<18x32xf32>
    %22 = arith.mulf %17, %21 : vector<18x32xf32>
    %c0_9 = arith.constant 0 : index
    %c0_10 = arith.constant 0 : index
    %23 = vector.load %arg4[%c0_9, %c0_10] : memref<1x32xf32, #tpu.memory_space<vmem>>, vector<1x32xf32>
    %24 = vector.broadcast %23 : vector<1x32xf32> to vector<18x32xf32>
    %25 = arith.mulf %22, %24 : vector<18x32xf32>
    %c0_11 = arith.constant 0 : index
    %c0_12 = arith.constant 0 : index
    %26 = vector.load %arg5[%c0_11, %c0_12] : memref<1x32xf32, #tpu.memory_space<vmem>>, vector<1x32xf32>
    %27 = vector.broadcast %26 : vector<1x32xf32> to vector<18x32xf32>
    %28 = arith.addf %25, %27 : vector<18x32xf32>
    %29 = arith.truncf %28 : vector<18x32xf32> to vector<18x32xbf16>
    %c0_13 = arith.constant 0 : index
    %c0_14 = arith.constant 0 : index
    %30 = vector.load %arg6[%c0_13, %c0_14] : memref<32x96xbf16, #tpu.memory_space<vmem>>, vector<32x96xbf16>
    %cst_15 = arith.constant dense<0.000000e+00> : vector<18x96xf32>
    %31 = tpu.matmul %29, %30, %cst_15 {dimension_numbers = #tpu.dot_dimension_numbers<[1], [0], [0], [1], [0, 0, 1, 1], [], []>} : vector<18x32xbf16>, vector<32x96xbf16>, vector<18x96xf32> -> vector<18x96xf32>
    %c0_16 = arith.constant 0 : index
    %c0_17 = arith.constant 0 : index
    %32 = vector.load %arg7[%c0_16, %c0_17] : memref<1x96xf32, #tpu.memory_space<vmem>>, vector<1x96xf32>
    %33 = vector.broadcast %32 : vector<1x96xf32> to vector<18x96xf32>
    %34 = arith.addf %31, %33 : vector<18x96xf32>
    %35 = arith.truncf %34 : vector<18x96xf32> to vector<18x96xbf16>
    %c0_18 = arith.constant 0 : index
    %c0_19 = arith.constant 0 : index
    %36 = vector.load %arg9[%c0_18, %c0_19] : memref<18x96xbf16, #tpu.memory_space<vmem>>, vector<18x96xbf16>
    tpu.vector_store %arg9[%c0_18, %c0_19], %35 {strides = array<i32>} : memref<18x96xbf16, #tpu.memory_space<vmem>>, vector<18x96xbf16>,
    return
  }
  func.func @transform_0(%arg0: i32, %arg1: i32) -> (i32, i32) {
    %c0_i32 = arith.constant 0 : i32
    %c0_i32_0 = arith.constant 0 : i32
    return %arg0, %c0_i32 : i32, i32
  }
  func.func @transform_1(%arg0: i32, %arg1: i32) -> (i32, i32) {
    %c0_i32 = arith.constant 0 : i32
    %c0_i32_0 = arith.constant 0 : i32
    return %arg0, %c0_i32 : i32, i32
  }
  func.func @transform_2(%arg0: i32, %arg1: i32) -> (i32, i32) {
    %c0_i32 = arith.constant 0 : i32
    %c0_i32_0 = arith.constant 0 : i32
    %c0_i32_1 = arith.constant 0 : i32
    return %c0_i32, %c0_i32_0 : i32, i32
  }
  func.func @transform_3(%arg0: i32, %arg1: i32) -> (i32, i32) {
    %c0_i32 = arith.constant 0 : i32
    %c0_i32_0 = arith.constant 0 : i32
    %c0_i32_1 = arith.constant 0 : i32
    return %c0_i32, %c0_i32_0 : i32, i32
  }
  func.func @transform_4(%arg0: i32, %arg1: i32) -> (i32, i32) {
    %c0_i32 = arith.constant 0 : i32
    %c0_i32_0 = arith.constant 0 : i32
    return %c0_i32, %arg1 : i32, i32
  }
  func.func @transform_5(%arg0: i32, %arg1: i32) -> (i32, i32) {
    %c0_i32 = arith.constant 0 : i32
    %c0_i32_0 = arith.constant 0 : i32
    return %c0_i32, %arg1 : i32, i32
  }
  func.func @transform_6(%arg0: i32, %arg1: i32) -> (i32, i32) {
    %c0_i32 = arith.constant 0 : i32
    %c0_i32_0 = arith.constant 0 : i32
    return %arg0, %c0_i32 : i32, i32
  }
  func.func @transform_7(%arg0: i32, %arg1: i32) -> (i32, i32) {
    %c0_i32 = arith.constant 0 : i32
    return %arg0, %arg1 : i32, i32
  }
}

module attributes {stable_mosaic.version = 11 : i64} {
  func.func @_linear_kernel(%arg0: i32, %arg1: i32, %arg2: i32, %arg3: memref<18x32xbf16, #tpu.memory_space<vmem>>, %arg4: memref<32x32xbf16, #tpu.memory_space<vmem>>, %arg5: memref<1x32xf32, #tpu.memory_space<vmem>>, %arg6: memref<18x32xbf16, #tpu.memory_space<vmem>>, %arg7: memref<18x32xf32, #tpu.memory_space<vmem>>) attributes {dimension_semantics = [#tpu.dimension_semantics<parallel>, #tpu.dimension_semantics<parallel>, #tpu.dimension_semantics<arbitrary>], iteration_bounds = array<i64: 1, 1, 1>, scalar_prefetch = 0 : i64, scratch_operands = 1 : i64, tpu.core_type = #tpu.core_type<tc>, window_params = [{transform_indices = @transform_0, window_bounds = array<i64: 18, 32>}, {transform_indices = @transform_1, window_bounds = array<i64: 32, 32>}, {transform_indices = @transform_2, window_bounds = array<i64: 1, 32>}, {transform_indices = @transform_3, window_bounds = array<i64: 18, 32>}]} {
    %c0_i32 = arith.constant 0 : i32
    %0 = arith.cmpi eq, %arg2, %c0_i32 : i32
    %1 = arith.extui %0 : i1 to i32
    %c0_i32_0 = arith.constant 0 : i32
    %2 = arith.cmpi ne, %1, %c0_i32_0 : i32
    scf.if %2 {
      %cst_10 = arith.constant 0.000000e+00 : f32
      %12 = vector.broadcast %cst_10 : f32 to vector<18x32xf32>
      %c0_11 = arith.constant 0 : index
      %c0_12 = arith.constant 0 : index
      %13 = vector.load %arg7[%c0_11, %c0_12] : memref<18x32xf32, #tpu.memory_space<vmem>>, vector<18x32xf32>
      tpu.vector_store %arg7[%c0_11, %c0_12], %12 {strides = array<i32>} : memref<18x32xf32, #tpu.memory_space<vmem>>, vector<18x32xf32>,
    } else {
    }
    %c0 = arith.constant 0 : index
    %c0_1 = arith.constant 0 : index
    %3 = vector.load %arg7[%c0, %c0_1] : memref<18x32xf32, #tpu.memory_space<vmem>>, vector<18x32xf32>
    %c0_2 = arith.constant 0 : index
    %c0_3 = arith.constant 0 : index
    %4 = vector.load %arg3[%c0_2, %c0_3] : memref<18x32xbf16, #tpu.memory_space<vmem>>, vector<18x32xbf16>
    %c0_4 = arith.constant 0 : index
    %c0_5 = arith.constant 0 : index
    %5 = vector.load %arg4[%c0_4, %c0_5] : memref<32x32xbf16, #tpu.memory_space<vmem>>, vector<32x32xbf16>
    %cst = arith.constant dense<0.000000e+00> : vector<18x32xf32>
    %6 = tpu.matmul %4, %5, %cst {dimension_numbers = #tpu.dot_dimension_numbers<[1], [0], [0], [1], [0, 0, 1, 1], [], []>} : vector<18x32xbf16>, vector<32x32xbf16>, vector<18x32xf32> -> vector<18x32xf32>
    %7 = arith.addf %3, %6 : vector<18x32xf32>
    %c0_6 = arith.constant 0 : index
    %c0_7 = arith.constant 0 : index
    %8 = vector.load %arg7[%c0_6, %c0_7] : memref<18x32xf32, #tpu.memory_space<vmem>>, vector<18x32xf32>
    tpu.vector_store %arg7[%c0_6, %c0_7], %7 {strides = array<i32>} : memref<18x32xf32, #tpu.memory_space<vmem>>, vector<18x32xf32>,
    %c0_i32_8 = arith.constant 0 : i32
    %9 = arith.cmpi eq, %arg2, %c0_i32_8 : i32
    %10 = arith.extui %9 : i1 to i32
    %c0_i32_9 = arith.constant 0 : i32
    %11 = arith.cmpi ne, %10, %c0_i32_9 : i32
    scf.if %11 {
      %c0_10 = arith.constant 0 : index
      %c0_11 = arith.constant 0 : index
      %12 = vector.load %arg7[%c0_10, %c0_11] : memref<18x32xf32, #tpu.memory_space<vmem>>, vector<18x32xf32>
      %c0_12 = arith.constant 0 : index
      %c0_13 = arith.constant 0 : index
      %13 = vector.load %arg5[%c0_12, %c0_13] : memref<1x32xf32, #tpu.memory_space<vmem>>, vector<1x32xf32>
      %14 = vector.broadcast %13 : vector<1x32xf32> to vector<18x32xf32>
      %15 = arith.addf %12, %14 : vector<18x32xf32>
      %16 = arith.truncf %15 : vector<18x32xf32> to vector<18x32xbf16>
      %c0_14 = arith.constant 0 : index
      %c0_15 = arith.constant 0 : index
      %17 = vector.load %arg6[%c0_14, %c0_15] : memref<18x32xbf16, #tpu.memory_space<vmem>>, vector<18x32xbf16>
      tpu.vector_store %arg6[%c0_14, %c0_15], %16 {strides = array<i32>} : memref<18x32xbf16, #tpu.memory_space<vmem>>, vector<18x32xbf16>,
    } else {
    }
    return
  }
  func.func @transform_0(%arg0: i32, %arg1: i32, %arg2: i32) -> (i32, i32) {
    %c0_i32 = arith.constant 0 : i32
    return %arg0, %arg2 : i32, i32
  }
  func.func @transform_1(%arg0: i32, %arg1: i32, %arg2: i32) -> (i32, i32) {
    %c0_i32 = arith.constant 0 : i32
    return %arg2, %arg1 : i32, i32
  }
  func.func @transform_2(%arg0: i32, %arg1: i32, %arg2: i32) -> (i32, i32) {
    %c0_i32 = arith.constant 0 : i32
    %c0_i32_0 = arith.constant 0 : i32
    return %c0_i32, %arg1 : i32, i32
  }
  func.func @transform_3(%arg0: i32, %arg1: i32, %arg2: i32) -> (i32, i32) {
    %c0_i32 = arith.constant 0 : i32
    return %arg0, %arg1 : i32, i32
  }
}

module attributes {stable_mosaic.version = 11 : i64} {
  func.func @_attn_kernel(%arg0: i32, %arg1: memref<1x9x96xbf16, #tpu.memory_space<vmem>>, %arg2: memref<1x9x32xbf16, #tpu.memory_space<vmem>>) attributes {dimension_semantics = [#tpu.dimension_semantics<parallel>], iteration_bounds = array<i64: 2>, scalar_prefetch = 0 : i64, scratch_operands = 0 : i64, tpu.core_type = #tpu.core_type<tc>, window_params = [{transform_indices = @transform_0, window_bounds = array<i64: 1, 9, 96>}, {transform_indices = @transform_1, window_bounds = array<i64: 1, 9, 32>}]} {
    %c0 = arith.constant 0 : index
    %c0_0 = arith.constant 0 : index
    %c0_1 = arith.constant 0 : index
    %0 = vector.load %arg1[%c0, %c0_0, %c0_1] : memref<1x9x96xbf16, #tpu.memory_space<vmem>>, vector<1x9x8xbf16>
    %1 = vector.shape_cast %0 : vector<1x9x8xbf16> to vector<9x8xbf16>
    %c0_2 = arith.constant 0 : index
    %c0_3 = arith.constant 0 : index
    %c32 = arith.constant 32 : index
    %2 = vector.load %arg1[%c0_2, %c0_3, %c32] : memref<1x9x96xbf16, #tpu.memory_space<vmem>>, vector<1x9x8xbf16>
    %3 = vector.shape_cast %2 : vector<1x9x8xbf16> to vector<9x8xbf16>
    %c0_4 = arith.constant 0 : index
    %c0_5 = arith.constant 0 : index
    %c64 = arith.constant 64 : index
    %4 = vector.load %arg1[%c0_4, %c0_5, %c64] : memref<1x9x96xbf16, #tpu.memory_space<vmem>>, vector<1x9x8xbf16>
    %5 = vector.shape_cast %4 : vector<1x9x8xbf16> to vector<9x8xbf16>
    %cst = arith.constant dense<0.000000e+00> : vector<9x9xf32>
    %6 = tpu.matmul %1, %3, %cst {dimension_numbers = #tpu.dot_dimension_numbers<[1], [1], [0], [0], [0, 0, 1, 0], [], []>} : vector<9x8xbf16>, vector<9x8xbf16>, vector<9x9xf32> -> vector<9x9xf32>
    %cst_6 = arith.constant 0.353553385 : f32
    %7 = vector.broadcast %cst_6 : f32 to vector<9x9xf32>
    %8 = arith.mulf %6, %7 : vector<9x9xf32>
    %cst_7 = arith.constant dense<0xFF800000> : vector<9xf32>
    %9 = vector.multi_reduction <maximumf>, %8, %cst_7 [1] : vector<9x9xf32> to vector<9xf32>
    %10 = vector.shape_cast %9 : vector<9xf32> to vector<9x1xf32>
    %11 = vector.broadcast %10 : vector<9x1xf32> to vector<9x9xf32>
    %12 = arith.subf %8, %11 : vector<9x9xf32>
    %13 = math.exp %12 : vector<9x9xf32>
    %cst_8 = arith.constant dense<0.000000e+00> : vector<9xf32>
    %14 = vector.multi_reduction <add>, %13, %cst_8 [1] : vector<9x9xf32> to vector<9xf32>
    %15 = vector.shape_cast %14 : vector<9xf32> to vector<9x1xf32>
    %16 = tpu.reciprocal %15 {approx = true} : vector<9x1xf32> -> vector<9x1xf32>
    %17 = vector.broadcast %16 : vector<9x1xf32> to vector<9x9xf32>
    %18 = arith.mulf %13, %17 : vector<9x9xf32>
    %19 = arith.truncf %18 : vector<9x9xf32> to vector<9x9xbf16>
    %cst_9 = arith.constant dense<0.000000e+00> : vector<9x8xf32>
    %20 = tpu.matmul %19, %5, %cst_9 {dimension_numbers = #tpu.dot_dimension_numbers<[1], [0], [0], [1], [0, 0, 1, 1], [], []>} : vector<9x9xbf16>, vector<9x8xbf16>, vector<9x8xf32> -> vector<9x8xf32>
    %c0_10 = arith.constant 0 : index
    %c0_11 = arith.constant 0 : index
    %c8 = arith.constant 8 : index
    %21 = vector.load %arg1[%c0_10, %c0_11, %c8] : memref<1x9x96xbf16, #tpu.memory_space<vmem>>, vector<1x9x8xbf16>
    %22 = vector.shape_cast %21 : vector<1x9x8xbf16> to vector<9x8xbf16>
    %c0_12 = arith.constant 0 : index
    %c0_13 = arith.constant 0 : index
    %c40 = arith.constant 40 : index
    %23 = vector.load %arg1[%c0_12, %c0_13, %c40] : memref<1x9x96xbf16, #tpu.memory_space<vmem>>, vector<1x9x8xbf16>
    %24 = vector.shape_cast %23 : vector<1x9x8xbf16> to vector<9x8xbf16>
    %c0_14 = arith.constant 0 : index
    %c0_15 = arith.constant 0 : index
    %c72 = arith.constant 72 : index
    %25 = vector.load %arg1[%c0_14, %c0_15, %c72] : memref<1x9x96xbf16, #tpu.memory_space<vmem>>, vector<1x9x8xbf16>
    %26 = vector.shape_cast %25 : vector<1x9x8xbf16> to vector<9x8xbf16>
    %cst_16 = arith.constant dense<0.000000e+00> : vector<9x9xf32>
    %27 = tpu.matmul %22, %24, %cst_16 {dimension_numbers = #tpu.dot_dimension_numbers<[1], [1], [0], [0], [0, 0, 1, 0], [], []>} : vector<9x8xbf16>, vector<9x8xbf16>, vector<9x9xf32> -> vector<9x9xf32>
    %cst_17 = arith.constant 0.353553385 : f32
    %28 = vector.broadcast %cst_17 : f32 to vector<9x9xf32>
    %29 = arith.mulf %27, %28 : vector<9x9xf32>
    %cst_18 = arith.constant dense<0xFF800000> : vector<9xf32>
    %30 = vector.multi_reduction <maximumf>, %29, %cst_18 [1] : vector<9x9xf32> to vector<9xf32>
    %31 = vector.shape_cast %30 : vector<9xf32> to vector<9x1xf32>
    %32 = vector.broadcast %31 : vector<9x1xf32> to vector<9x9xf32>
    %33 = arith.subf %29, %32 : vector<9x9xf32>
    %34 = math.exp %33 : vector<9x9xf32>
    %cst_19 = arith.constant dense<0.000000e+00> : vector<9xf32>
    %35 = vector.multi_reduction <add>, %34, %cst_19 [1] : vector<9x9xf32> to vector<9xf32>
    %36 = vector.shape_cast %35 : vector<9xf32> to vector<9x1xf32>
    %37 = tpu.reciprocal %36 {approx = true} : vector<9x1xf32> -> vector<9x1xf32>
    %38 = vector.broadcast %37 : vector<9x1xf32> to vector<9x9xf32>
    %39 = arith.mulf %34, %38 : vector<9x9xf32>
    %40 = arith.truncf %39 : vector<9x9xf32> to vector<9x9xbf16>
    %cst_20 = arith.constant dense<0.000000e+00> : vector<9x8xf32>
    %41 = tpu.matmul %40, %26, %cst_20 {dimension_numbers = #tpu.dot_dimension_numbers<[1], [0], [0], [1], [0, 0, 1, 1], [], []>} : vector<9x9xbf16>, vector<9x8xbf16>, vector<9x8xf32> -> vector<9x8xf32>
    %c0_21 = arith.constant 0 : index
    %c0_22 = arith.constant 0 : index
    %c16 = arith.constant 16 : index
    %42 = vector.load %arg1[%c0_21, %c0_22, %c16] : memref<1x9x96xbf16, #tpu.memory_space<vmem>>, vector<1x9x8xbf16>
    %43 = vector.shape_cast %42 : vector<1x9x8xbf16> to vector<9x8xbf16>
    %c0_23 = arith.constant 0 : index
    %c0_24 = arith.constant 0 : index
    %c48 = arith.constant 48 : index
    %44 = vector.load %arg1[%c0_23, %c0_24, %c48] : memref<1x9x96xbf16, #tpu.memory_space<vmem>>, vector<1x9x8xbf16>
    %45 = vector.shape_cast %44 : vector<1x9x8xbf16> to vector<9x8xbf16>
    %c0_25 = arith.constant 0 : index
    %c0_26 = arith.constant 0 : index
    %c80 = arith.constant 80 : index
    %46 = vector.load %arg1[%c0_25, %c0_26, %c80] : memref<1x9x96xbf16, #tpu.memory_space<vmem>>, vector<1x9x8xbf16>
    %47 = vector.shape_cast %46 : vector<1x9x8xbf16> to vector<9x8xbf16>
    %cst_27 = arith.constant dense<0.000000e+00> : vector<9x9xf32>
    %48 = tpu.matmul %43, %45, %cst_27 {dimension_numbers = #tpu.dot_dimension_numbers<[1], [1], [0], [0], [0, 0, 1, 0], [], []>} : vector<9x8xbf16>, vector<9x8xbf16>, vector<9x9xf32> -> vector<9x9xf32>
    %cst_28 = arith.constant 0.353553385 : f32
    %49 = vector.broadcast %cst_28 : f32 to vector<9x9xf32>
    %50 = arith.mulf %48, %49 : vector<9x9xf32>
    %cst_29 = arith.constant dense<0xFF800000> : vector<9xf32>
    %51 = vector.multi_reduction <maximumf>, %50, %cst_29 [1] : vector<9x9xf32> to vector<9xf32>
    %52 = vector.shape_cast %51 : vector<9xf32> to vector<9x1xf32>
    %53 = vector.broadcast %52 : vector<9x1xf32> to vector<9x9xf32>
    %54 = arith.subf %50, %53 : vector<9x9xf32>
    %55 = math.exp %54 : vector<9x9xf32>
    %cst_30 = arith.constant dense<0.000000e+00> : vector<9xf32>
    %56 = vector.multi_reduction <add>, %55, %cst_30 [1] : vector<9x9xf32> to vector<9xf32>
    %57 = vector.shape_cast %56 : vector<9xf32> to vector<9x1xf32>
    %58 = tpu.reciprocal %57 {approx = true} : vector<9x1xf32> -> vector<9x1xf32>
    %59 = vector.broadcast %58 : vector<9x1xf32> to vector<9x9xf32>
    %60 = arith.mulf %55, %59 : vector<9x9xf32>
    %61 = arith.truncf %60 : vector<9x9xf32> to vector<9x9xbf16>
    %cst_31 = arith.constant dense<0.000000e+00> : vector<9x8xf32>
    %62 = tpu.matmul %61, %47, %cst_31 {dimension_numbers = #tpu.dot_dimension_numbers<[1], [0], [0], [1], [0, 0, 1, 1], [], []>} : vector<9x9xbf16>, vector<9x8xbf16>, vector<9x8xf32> -> vector<9x8xf32>
    %c0_32 = arith.constant 0 : index
    %c0_33 = arith.constant 0 : index
    %c24 = arith.constant 24 : index
    %63 = vector.load %arg1[%c0_32, %c0_33, %c24] : memref<1x9x96xbf16, #tpu.memory_space<vmem>>, vector<1x9x8xbf16>
    %64 = vector.shape_cast %63 : vector<1x9x8xbf16> to vector<9x8xbf16>
    %c0_34 = arith.constant 0 : index
    %c0_35 = arith.constant 0 : index
    %c56 = arith.constant 56 : index
    %65 = vector.load %arg1[%c0_34, %c0_35, %c56] : memref<1x9x96xbf16, #tpu.memory_space<vmem>>, vector<1x9x8xbf16>
    %66 = vector.shape_cast %65 : vector<1x9x8xbf16> to vector<9x8xbf16>
    %c0_36 = arith.constant 0 : index
    %c0_37 = arith.constant 0 : index
    %c88 = arith.constant 88 : index
    %67 = vector.load %arg1[%c0_36, %c0_37, %c88] : memref<1x9x96xbf16, #tpu.memory_space<vmem>>, vector<1x9x8xbf16>
    %68 = vector.shape_cast %67 : vector<1x9x8xbf16> to vector<9x8xbf16>
    %cst_38 = arith.constant dense<0.000000e+00> : vector<9x9xf32>
    %69 = tpu.matmul %64, %66, %cst_38 {dimension_numbers = #tpu.dot_dimension_numbers<[1], [1], [0], [0], [0, 0, 1, 0], [], []>} : vector<9x8xbf16>, vector<9x8xbf16>, vector<9x9xf32> -> vector<9x9xf32>
    %cst_39 = arith.constant 0.353553385 : f32
    %70 = vector.broadcast %cst_39 : f32 to vector<9x9xf32>
    %71 = arith.mulf %69, %70 : vector<9x9xf32>
    %cst_40 = arith.constant dense<0xFF800000> : vector<9xf32>
    %72 = vector.multi_reduction <maximumf>, %71, %cst_40 [1] : vector<9x9xf32> to vector<9xf32>
    %73 = vector.shape_cast %72 : vector<9xf32> to vector<9x1xf32>
    %74 = vector.broadcast %73 : vector<9x1xf32> to vector<9x9xf32>
    %75 = arith.subf %71, %74 : vector<9x9xf32>
    %76 = math.exp %75 : vector<9x9xf32>
    %cst_41 = arith.constant dense<0.000000e+00> : vector<9xf32>
    %77 = vector.multi_reduction <add>, %76, %cst_41 [1] : vector<9x9xf32> to vector<9xf32>
    %78 = vector.shape_cast %77 : vector<9xf32> to vector<9x1xf32>
    %79 = tpu.reciprocal %78 {approx = true} : vector<9x1xf32> -> vector<9x1xf32>
    %80 = vector.broadcast %79 : vector<9x1xf32> to vector<9x9xf32>
    %81 = arith.mulf %76, %80 : vector<9x9xf32>
    %82 = arith.truncf %81 : vector<9x9xf32> to vector<9x9xbf16>
    %cst_42 = arith.constant dense<0.000000e+00> : vector<9x8xf32>
    %83 = tpu.matmul %82, %68, %cst_42 {dimension_numbers = #tpu.dot_dimension_numbers<[1], [0], [0], [1], [0, 0, 1, 1], [], []>} : vector<9x9xbf16>, vector<9x8xbf16>, vector<9x8xf32> -> vector<9x8xf32>
    %84 = tpu.concatenate %20, %41, %62, %83 in 1 : vector<9x8xf32>, vector<9x8xf32>, vector<9x8xf32>, vector<9x8xf32> -> vector<9x32xf32>
    %85 = arith.truncf %84 : vector<9x32xf32> to vector<9x32xbf16>
    %c0_43 = arith.constant 0 : index
    %c0_44 = arith.constant 0 : index
    %c0_45 = arith.constant 0 : index
    %86 = vector.load %arg2[%c0_43, %c0_44, %c0_45] : memref<1x9x32xbf16, #tpu.memory_space<vmem>>, vector<1x9x32xbf16>
    %87 = vector.shape_cast %86 : vector<1x9x32xbf16> to vector<9x32xbf16>
    %88 = vector.shape_cast %85 : vector<9x32xbf16> to vector<1x9x32xbf16>
    tpu.vector_store %arg2[%c0_43, %c0_44, %c0_45], %88 {strides = array<i32>} : memref<1x9x32xbf16, #tpu.memory_space<vmem>>, vector<1x9x32xbf16>,
    return
  }
  func.func @transform_0(%arg0: i32) -> (i32, i32, i32) {
    %c0_i32 = arith.constant 0 : i32
    %c0_i32_0 = arith.constant 0 : i32
    %c0_i32_1 = arith.constant 0 : i32
    return %arg0, %c0_i32, %c0_i32_0 : i32, i32, i32
  }
  func.func @transform_1(%arg0: i32) -> (i32, i32, i32) {
    %c0_i32 = arith.constant 0 : i32
    %c0_i32_0 = arith.constant 0 : i32
    %c0_i32_1 = arith.constant 0 : i32
    return %arg0, %c0_i32, %c0_i32_0 : i32, i32, i32
  }
}

module attributes {stable_mosaic.version = 11 : i64} {
  func.func @_add_ln_matmul_kernel(%arg0: i32, %arg1: i32, %arg2: memref<18x32xbf16, #tpu.memory_space<vmem>>, %arg3: memref<18x32xf32, #tpu.memory_space<vmem>>, %arg4: memref<1x32xf32, #tpu.memory_space<vmem>>, %arg5: memref<1x32xf32, #tpu.memory_space<vmem>>, %arg6: memref<32x128xbf16, #tpu.memory_space<vmem>>, %arg7: memref<1x128xf32, #tpu.memory_space<vmem>>, %arg8: memref<18x32xf32, #tpu.memory_space<vmem>>, %arg9: memref<18x128xbf16, #tpu.memory_space<vmem>>) attributes {dimension_semantics = [#tpu.dimension_semantics<parallel>, #tpu.dimension_semantics<arbitrary>], iteration_bounds = array<i64: 1, 1>, scalar_prefetch = 0 : i64, scratch_operands = 0 : i64, tpu.core_type = #tpu.core_type<tc>, window_params = [{transform_indices = @transform_0, window_bounds = array<i64: 18, 32>}, {transform_indices = @transform_1, window_bounds = array<i64: 18, 32>}, {pipeline_mode = #tpu.pipeline_mode<synchronous>, transform_indices = @transform_2, window_bounds = array<i64: 1, 32>}, {pipeline_mode = #tpu.pipeline_mode<synchronous>, transform_indices = @transform_3, window_bounds = array<i64: 1, 32>}, {transform_indices = @transform_4, window_bounds = array<i64: 32, 128>}, {transform_indices = @transform_5, window_bounds = array<i64: 1, 128>}, {transform_indices = @transform_6, window_bounds = array<i64: 18, 32>}, {transform_indices = @transform_7, window_bounds = array<i64: 18, 128>}]} {
    %c0 = arith.constant 0 : index
    %c0_0 = arith.constant 0 : index
    %0 = vector.load %arg2[%c0, %c0_0] : memref<18x32xbf16, #tpu.memory_space<vmem>>, vector<18x32xbf16>
    %1 = arith.extf %0 : vector<18x32xbf16> to vector<18x32xf32>
    %c0_1 = arith.constant 0 : index
    %c0_2 = arith.constant 0 : index
    %2 = vector.load %arg3[%c0_1, %c0_2] : memref<18x32xf32, #tpu.memory_space<vmem>>, vector<18x32xf32>
    %3 = arith.addf %1, %2 : vector<18x32xf32>
    %c0_3 = arith.constant 0 : index
    %c0_4 = arith.constant 0 : index
    %4 = vector.load %arg8[%c0_3, %c0_4] : memref<18x32xf32, #tpu.memory_space<vmem>>, vector<18x32xf32>
    tpu.vector_store %arg8[%c0_3, %c0_4], %3 {strides = array<i32>} : memref<18x32xf32, #tpu.memory_space<vmem>>, vector<18x32xf32>,
    %cst = arith.constant dense<0.000000e+00> : vector<18xf32>
    %5 = vector.multi_reduction <add>, %3, %cst [1] : vector<18x32xf32> to vector<18xf32>
    %6 = vector.shape_cast %5 : vector<18xf32> to vector<18x1xf32>
    %cst_5 = arith.constant 3.200000e+01 : f32
    %7 = vector.broadcast %cst_5 : f32 to vector<18x1xf32>
    %8 = arith.divf %6, %7 : vector<18x1xf32>
    %9 = vector.broadcast %8 : vector<18x1xf32> to vector<18x32xf32>
    %10 = arith.subf %3, %9 : vector<18x32xf32>
    %11 = arith.mulf %10, %10 : vector<18x32xf32>
    %cst_6 = arith.constant dense<0.000000e+00> : vector<18xf32>
    %12 = vector.multi_reduction <add>, %11, %cst_6 [1] : vector<18x32xf32> to vector<18xf32>
    %13 = vector.shape_cast %12 : vector<18xf32> to vector<18x1xf32>
    %cst_7 = arith.constant 3.200000e+01 : f32
    %14 = vector.broadcast %cst_7 : f32 to vector<18x1xf32>
    %15 = arith.divf %13, %14 : vector<18x1xf32>
    %16 = vector.broadcast %8 : vector<18x1xf32> to vector<18x32xf32>
    %17 = arith.subf %3, %16 : vector<18x32xf32>
    %cst_8 = arith.constant 9.99999997E-7 : f32
    %18 = vector.broadcast %cst_8 : f32 to vector<18x1xf32>
    %19 = arith.addf %15, %18 : vector<18x1xf32>
    %20 = math.rsqrt %19 : vector<18x1xf32>
    %21 = vector.broadcast %20 : vector<18x1xf32> to vector<18x32xf32>
    %22 = arith.mulf %17, %21 : vector<18x32xf32>
    %c0_9 = arith.constant 0 : index
    %c0_10 = arith.constant 0 : index
    %23 = vector.load %arg4[%c0_9, %c0_10] : memref<1x32xf32, #tpu.memory_space<vmem>>, vector<1x32xf32>
    %24 = vector.broadcast %23 : vector<1x32xf32> to vector<18x32xf32>
    %25 = arith.mulf %22, %24 : vector<18x32xf32>
    %c0_11 = arith.constant 0 : index
    %c0_12 = arith.constant 0 : index
    %26 = vector.load %arg5[%c0_11, %c0_12] : memref<1x32xf32, #tpu.memory_space<vmem>>, vector<1x32xf32>
    %27 = vector.broadcast %26 : vector<1x32xf32> to vector<18x32xf32>
    %28 = arith.addf %25, %27 : vector<18x32xf32>
    %29 = arith.truncf %28 : vector<18x32xf32> to vector<18x32xbf16>
    %c0_13 = arith.constant 0 : index
    %c0_14 = arith.constant 0 : index
    %30 = vector.load %arg6[%c0_13, %c0_14] : memref<32x128xbf16, #tpu.memory_space<vmem>>, vector<32x128xbf16>
    %cst_15 = arith.constant dense<0.000000e+00> : vector<18x128xf32>
    %31 = tpu.matmul %29, %30, %cst_15 {dimension_numbers = #tpu.dot_dimension_numbers<[1], [0], [0], [1], [0, 0, 1, 1], [], []>} : vector<18x32xbf16>, vector<32x128xbf16>, vector<18x128xf32> -> vector<18x128xf32>
    %c0_16 = arith.constant 0 : index
    %c0_17 = arith.constant 0 : index
    %32 = vector.load %arg7[%c0_16, %c0_17] : memref<1x128xf32, #tpu.memory_space<vmem>>, vector<1x128xf32>
    %33 = vector.broadcast %32 : vector<1x128xf32> to vector<18x128xf32>
    %34 = arith.addf %31, %33 : vector<18x128xf32>
    %cst_18 = arith.constant 5.000000e-01 : f32
    %35 = vector.broadcast %cst_18 : f32 to vector<18x128xf32>
    %36 = arith.mulf %35, %34 : vector<18x128xf32>
    %cst_19 = arith.constant 0.707106769 : f32
    %37 = vector.broadcast %cst_19 : f32 to vector<18x128xf32>
    %38 = arith.mulf %34, %37 : vector<18x128xf32>
    %39 = math.absf %38 : vector<18x128xf32>
    %cst_20 = arith.constant 0.327591091 : f32
    %40 = vector.broadcast %cst_20 : f32 to vector<18x128xf32>
    %41 = arith.mulf %40, %39 : vector<18x128xf32>
    %cst_21 = arith.constant 1.000000e+00 : f32
    %42 = vector.broadcast %cst_21 : f32 to vector<18x128xf32>
    %43 = arith.addf %42, %41 : vector<18x128xf32>
    %cst_22 = arith.constant 1.000000e+00 : f32
    %44 = vector.broadcast %cst_22 : f32 to vector<18x128xf32>
    %45 = arith.divf %44, %43 : vector<18x128xf32>
    %cst_23 = arith.constant 1.06140542 : f32
    %46 = vector.broadcast %cst_23 : f32 to vector<18x128xf32>
    %47 = arith.mulf %46, %45 : vector<18x128xf32>
    %cst_24 = arith.constant -1.45315206 : f32
    %48 = vector.broadcast %cst_24 : f32 to vector<18x128xf32>
    %49 = arith.addf %47, %48 : vector<18x128xf32>
    %50 = arith.mulf %49, %45 : vector<18x128xf32>
    %cst_25 = arith.constant 1.42141378 : f32
    %51 = vector.broadcast %cst_25 : f32 to vector<18x128xf32>
    %52 = arith.addf %50, %51 : vector<18x128xf32>
    %53 = arith.mulf %52, %45 : vector<18x128xf32>
    %cst_26 = arith.constant -0.284496725 : f32
    %54 = vector.broadcast %cst_26 : f32 to vector<18x128xf32>
    %55 = arith.addf %53, %54 : vector<18x128xf32>
    %56 = arith.mulf %55, %45 : vector<18x128xf32>
    %cst_27 = arith.constant 0.254829586 : f32
    %57 = vector.broadcast %cst_27 : f32 to vector<18x128xf32>
    %58 = arith.addf %56, %57 : vector<18x128xf32>
    %59 = arith.mulf %58, %45 : vector<18x128xf32>
    %cst_28 = arith.constant 0.000000e+00 : f32
    %60 = vector.broadcast %cst_28 : f32 to vector<18x128xf32>
    %61 = arith.subf %60, %39 : vector<18x128xf32>
    %62 = arith.mulf %61, %39 : vector<18x128xf32>
    %63 = math.exp %62 : vector<18x128xf32>
    %64 = arith.mulf %59, %63 : vector<18x128xf32>
    %cst_29 = arith.constant 1.000000e+00 : f32
    %65 = vector.broadcast %cst_29 : f32 to vector<18x128xf32>
    %66 = arith.subf %65, %64 : vector<18x128xf32>
    %cst_30 = arith.constant 0.000000e+00 : f32
    %67 = vector.broadcast %cst_30 : f32 to vector<18x128xf32>
    %68 = arith.cmpf oge, %38, %67 : vector<18x128xf32>
    %cst_31 = arith.constant 0.000000e+00 : f32
    %69 = vector.broadcast %cst_31 : f32 to vector<18x128xf32>
    %70 = arith.subf %69, %66 : vector<18x128xf32>
    %71 = arith.select %68, %66, %70 : vector<18x128xi1>, vector<18x128xf32>
    %cst_32 = arith.constant 1.000000e+00 : f32
    %72 = vector.broadcast %cst_32 : f32 to vector<18x128xf32>
    %73 = arith.addf %72, %71 : vector<18x128xf32>
    %74 = arith.mulf %36, %73 : vector<18x128xf32>
    %75 = arith.truncf %74 : vector<18x128xf32> to vector<18x128xbf16>
    %c0_33 = arith.constant 0 : index
    %c0_34 = arith.constant 0 : index
    %76 = vector.load %arg9[%c0_33, %c0_34] : memref<18x128xbf16, #tpu.memory_space<vmem>>, vector<18x128xbf16>
    tpu.vector_store %arg9[%c0_33, %c0_34], %75 {strides = array<i32>} : memref<18x128xbf16, #tpu.memory_space<vmem>>, vector<18x128xbf16>,
    return
  }
  func.func @transform_0(%arg0: i32, %arg1: i32) -> (i32, i32) {
    %c0_i32 = arith.constant 0 : i32
    %c0_i32_0 = arith.constant 0 : i32
    return %arg0, %c0_i32 : i32, i32
  }
  func.func @transform_1(%arg0: i32, %arg1: i32) -> (i32, i32) {
    %c0_i32 = arith.constant 0 : i32
    %c0_i32_0 = arith.constant 0 : i32
    return %arg0, %c0_i32 : i32, i32
  }
  func.func @transform_2(%arg0: i32, %arg1: i32) -> (i32, i32) {
    %c0_i32 = arith.constant 0 : i32
    %c0_i32_0 = arith.constant 0 : i32
    %c0_i32_1 = arith.constant 0 : i32
    return %c0_i32, %c0_i32_0 : i32, i32
  }
  func.func @transform_3(%arg0: i32, %arg1: i32) -> (i32, i32) {
    %c0_i32 = arith.constant 0 : i32
    %c0_i32_0 = arith.constant 0 : i32
    %c0_i32_1 = arith.constant 0 : i32
    return %c0_i32, %c0_i32_0 : i32, i32
  }
  func.func @transform_4(%arg0: i32, %arg1: i32) -> (i32, i32) {
    %c0_i32 = arith.constant 0 : i32
    %c0_i32_0 = arith.constant 0 : i32
    return %c0_i32, %arg1 : i32, i32
  }
  func.func @transform_5(%arg0: i32, %arg1: i32) -> (i32, i32) {
    %c0_i32 = arith.constant 0 : i32
    %c0_i32_0 = arith.constant 0 : i32
    return %c0_i32, %arg1 : i32, i32
  }
  func.func @transform_6(%arg0: i32, %arg1: i32) -> (i32, i32) {
    %c0_i32 = arith.constant 0 : i32
    %c0_i32_0 = arith.constant 0 : i32
    return %arg0, %c0_i32 : i32, i32
  }
  func.func @transform_7(%arg0: i32, %arg1: i32) -> (i32, i32) {
    %c0_i32 = arith.constant 0 : i32
    return %arg0, %arg1 : i32, i32
  }
}

module attributes {stable_mosaic.version = 11 : i64} {
  func.func @_linear_kernel(%arg0: i32, %arg1: i32, %arg2: i32, %arg3: memref<18x128xbf16, #tpu.memory_space<vmem>>, %arg4: memref<128x32xbf16, #tpu.memory_space<vmem>>, %arg5: memref<1x32xf32, #tpu.memory_space<vmem>>, %arg6: memref<18x32xbf16, #tpu.memory_space<vmem>>, %arg7: memref<18x32xf32, #tpu.memory_space<vmem>>) attributes {dimension_semantics = [#tpu.dimension_semantics<parallel>, #tpu.dimension_semantics<parallel>, #tpu.dimension_semantics<arbitrary>], iteration_bounds = array<i64: 1, 1, 1>, scalar_prefetch = 0 : i64, scratch_operands = 1 : i64, tpu.core_type = #tpu.core_type<tc>, window_params = [{transform_indices = @transform_0, window_bounds = array<i64: 18, 128>}, {transform_indices = @transform_1, window_bounds = array<i64: 128, 32>}, {transform_indices = @transform_2, window_bounds = array<i64: 1, 32>}, {transform_indices = @transform_3, window_bounds = array<i64: 18, 32>}]} {
    %c0_i32 = arith.constant 0 : i32
    %0 = arith.cmpi eq, %arg2, %c0_i32 : i32
    %1 = arith.extui %0 : i1 to i32
    %c0_i32_0 = arith.constant 0 : i32
    %2 = arith.cmpi ne, %1, %c0_i32_0 : i32
    scf.if %2 {
      %cst_10 = arith.constant 0.000000e+00 : f32
      %12 = vector.broadcast %cst_10 : f32 to vector<18x32xf32>
      %c0_11 = arith.constant 0 : index
      %c0_12 = arith.constant 0 : index
      %13 = vector.load %arg7[%c0_11, %c0_12] : memref<18x32xf32, #tpu.memory_space<vmem>>, vector<18x32xf32>
      tpu.vector_store %arg7[%c0_11, %c0_12], %12 {strides = array<i32>} : memref<18x32xf32, #tpu.memory_space<vmem>>, vector<18x32xf32>,
    } else {
    }
    %c0 = arith.constant 0 : index
    %c0_1 = arith.constant 0 : index
    %3 = vector.load %arg7[%c0, %c0_1] : memref<18x32xf32, #tpu.memory_space<vmem>>, vector<18x32xf32>
    %c0_2 = arith.constant 0 : index
    %c0_3 = arith.constant 0 : index
    %4 = vector.load %arg3[%c0_2, %c0_3] : memref<18x128xbf16, #tpu.memory_space<vmem>>, vector<18x128xbf16>
    %c0_4 = arith.constant 0 : index
    %c0_5 = arith.constant 0 : index
    %5 = vector.load %arg4[%c0_4, %c0_5] : memref<128x32xbf16, #tpu.memory_space<vmem>>, vector<128x32xbf16>
    %cst = arith.constant dense<0.000000e+00> : vector<18x32xf32>
    %6 = tpu.matmul %4, %5, %cst {dimension_numbers = #tpu.dot_dimension_numbers<[1], [0], [0], [1], [0, 0, 1, 1], [], []>} : vector<18x128xbf16>, vector<128x32xbf16>, vector<18x32xf32> -> vector<18x32xf32>
    %7 = arith.addf %3, %6 : vector<18x32xf32>
    %c0_6 = arith.constant 0 : index
    %c0_7 = arith.constant 0 : index
    %8 = vector.load %arg7[%c0_6, %c0_7] : memref<18x32xf32, #tpu.memory_space<vmem>>, vector<18x32xf32>
    tpu.vector_store %arg7[%c0_6, %c0_7], %7 {strides = array<i32>} : memref<18x32xf32, #tpu.memory_space<vmem>>, vector<18x32xf32>,
    %c0_i32_8 = arith.constant 0 : i32
    %9 = arith.cmpi eq, %arg2, %c0_i32_8 : i32
    %10 = arith.extui %9 : i1 to i32
    %c0_i32_9 = arith.constant 0 : i32
    %11 = arith.cmpi ne, %10, %c0_i32_9 : i32
    scf.if %11 {
      %c0_10 = arith.constant 0 : index
      %c0_11 = arith.constant 0 : index
      %12 = vector.load %arg7[%c0_10, %c0_11] : memref<18x32xf32, #tpu.memory_space<vmem>>, vector<18x32xf32>
      %c0_12 = arith.constant 0 : index
      %c0_13 = arith.constant 0 : index
      %13 = vector.load %arg5[%c0_12, %c0_13] : memref<1x32xf32, #tpu.memory_space<vmem>>, vector<1x32xf32>
      %14 = vector.broadcast %13 : vector<1x32xf32> to vector<18x32xf32>
      %15 = arith.addf %12, %14 : vector<18x32xf32>
      %16 = arith.truncf %15 : vector<18x32xf32> to vector<18x32xbf16>
      %c0_14 = arith.constant 0 : index
      %c0_15 = arith.constant 0 : index
      %17 = vector.load %arg6[%c0_14, %c0_15] : memref<18x32xbf16, #tpu.memory_space<vmem>>, vector<18x32xbf16>
      tpu.vector_store %arg6[%c0_14, %c0_15], %16 {strides = array<i32>} : memref<18x32xbf16, #tpu.memory_space<vmem>>, vector<18x32xbf16>,
    } else {
    }
    return
  }
  func.func @transform_0(%arg0: i32, %arg1: i32, %arg2: i32) -> (i32, i32) {
    %c0_i32 = arith.constant 0 : i32
    return %arg0, %arg2 : i32, i32
  }
  func.func @transform_1(%arg0: i32, %arg1: i32, %arg2: i32) -> (i32, i32) {
    %c0_i32 = arith.constant 0 : i32
    return %arg2, %arg1 : i32, i32
  }
  func.func @transform_2(%arg0: i32, %arg1: i32, %arg2: i32) -> (i32, i32) {
    %c0_i32 = arith.constant 0 : i32
    %c0_i32_0 = arith.constant 0 : i32
    return %c0_i32, %arg1 : i32, i32
  }
  func.func @transform_3(%arg0: i32, %arg1: i32, %arg2: i32) -> (i32, i32) {
    %c0_i32 = arith.constant 0 : i32
    return %arg0, %arg1 : i32, i32
  }
}

module attributes {stable_mosaic.version = 11 : i64} {
  func.func @_add_ln_kernel(%arg0: i32, %arg1: memref<18x32xbf16, #tpu.memory_space<vmem>>, %arg2: memref<18x32xf32, #tpu.memory_space<vmem>>, %arg3: memref<1x32xf32, #tpu.memory_space<vmem>>, %arg4: memref<1x32xf32, #tpu.memory_space<vmem>>, %arg5: memref<18x32xf32, #tpu.memory_space<vmem>>) attributes {dimension_semantics = [#tpu.dimension_semantics<parallel>], iteration_bounds = array<i64: 1>, scalar_prefetch = 0 : i64, scratch_operands = 0 : i64, tpu.core_type = #tpu.core_type<tc>, window_params = [{transform_indices = @transform_0, window_bounds = array<i64: 18, 32>}, {transform_indices = @transform_1, window_bounds = array<i64: 18, 32>}, {pipeline_mode = #tpu.pipeline_mode<synchronous>, transform_indices = @transform_2, window_bounds = array<i64: 1, 32>}, {pipeline_mode = #tpu.pipeline_mode<synchronous>, transform_indices = @transform_3, window_bounds = array<i64: 1, 32>}, {transform_indices = @transform_4, window_bounds = array<i64: 18, 32>}]} {
    %c0 = arith.constant 0 : index
    %c0_0 = arith.constant 0 : index
    %0 = vector.load %arg1[%c0, %c0_0] : memref<18x32xbf16, #tpu.memory_space<vmem>>, vector<18x32xbf16>
    %1 = arith.extf %0 : vector<18x32xbf16> to vector<18x32xf32>
    %c0_1 = arith.constant 0 : index
    %c0_2 = arith.constant 0 : index
    %2 = vector.load %arg2[%c0_1, %c0_2] : memref<18x32xf32, #tpu.memory_space<vmem>>, vector<18x32xf32>
    %3 = arith.addf %1, %2 : vector<18x32xf32>
    %cst = arith.constant dense<0.000000e+00> : vector<18xf32>
    %4 = vector.multi_reduction <add>, %3, %cst [1] : vector<18x32xf32> to vector<18xf32>
    %5 = vector.shape_cast %4 : vector<18xf32> to vector<18x1xf32>
    %cst_3 = arith.constant 3.200000e+01 : f32
    %6 = vector.broadcast %cst_3 : f32 to vector<18x1xf32>
    %7 = arith.divf %5, %6 : vector<18x1xf32>
    %8 = vector.broadcast %7 : vector<18x1xf32> to vector<18x32xf32>
    %9 = arith.subf %3, %8 : vector<18x32xf32>
    %10 = arith.mulf %9, %9 : vector<18x32xf32>
    %cst_4 = arith.constant dense<0.000000e+00> : vector<18xf32>
    %11 = vector.multi_reduction <add>, %10, %cst_4 [1] : vector<18x32xf32> to vector<18xf32>
    %12 = vector.shape_cast %11 : vector<18xf32> to vector<18x1xf32>
    %cst_5 = arith.constant 3.200000e+01 : f32
    %13 = vector.broadcast %cst_5 : f32 to vector<18x1xf32>
    %14 = arith.divf %12, %13 : vector<18x1xf32>
    %15 = vector.broadcast %7 : vector<18x1xf32> to vector<18x32xf32>
    %16 = arith.subf %3, %15 : vector<18x32xf32>
    %cst_6 = arith.constant 9.99999997E-7 : f32
    %17 = vector.broadcast %cst_6 : f32 to vector<18x1xf32>
    %18 = arith.addf %14, %17 : vector<18x1xf32>
    %19 = math.rsqrt %18 : vector<18x1xf32>
    %20 = vector.broadcast %19 : vector<18x1xf32> to vector<18x32xf32>
    %21 = arith.mulf %16, %20 : vector<18x32xf32>
    %c0_7 = arith.constant 0 : index
    %c0_8 = arith.constant 0 : index
    %22 = vector.load %arg3[%c0_7, %c0_8] : memref<1x32xf32, #tpu.memory_space<vmem>>, vector<1x32xf32>
    %23 = vector.broadcast %22 : vector<1x32xf32> to vector<18x32xf32>
    %24 = arith.mulf %21, %23 : vector<18x32xf32>
    %c0_9 = arith.constant 0 : index
    %c0_10 = arith.constant 0 : index
    %25 = vector.load %arg4[%c0_9, %c0_10] : memref<1x32xf32, #tpu.memory_space<vmem>>, vector<1x32xf32>
    %26 = vector.broadcast %25 : vector<1x32xf32> to vector<18x32xf32>
    %27 = arith.addf %24, %26 : vector<18x32xf32>
    %c0_11 = arith.constant 0 : index
    %c0_12 = arith.constant 0 : index
    %28 = vector.load %arg5[%c0_11, %c0_12] : memref<18x32xf32, #tpu.memory_space<vmem>>, vector<18x32xf32>
    tpu.vector_store %arg5[%c0_11, %c0_12], %27 {strides = array<i32>} : memref<18x32xf32, #tpu.memory_space<vmem>>, vector<18x32xf32>,
    return
  }
  func.func @transform_0(%arg0: i32) -> (i32, i32) {
    %c0_i32 = arith.constant 0 : i32
    %c0_i32_0 = arith.constant 0 : i32
    return %arg0, %c0_i32 : i32, i32
  }
  func.func @transform_1(%arg0: i32) -> (i32, i32) {
    %c0_i32 = arith.constant 0 : i32
    %c0_i32_0 = arith.constant 0 : i32
    return %arg0, %c0_i32 : i32, i32
  }
  func.func @transform_2(%arg0: i32) -> (i32, i32) {
    %c0_i32 = arith.constant 0 : i32
    %c0_i32_0 = arith.constant 0 : i32
    %c0_i32_1 = arith.constant 0 : i32
    return %c0_i32, %c0_i32_0 : i32, i32
  }
  func.func @transform_3(%arg0: i32) -> (i32, i32) {
    %c0_i32 = arith.constant 0 : i32
    %c0_i32_0 = arith.constant 0 : i32
    %c0_i32_1 = arith.constant 0 : i32
    return %c0_i32, %c0_i32_0 : i32, i32
  }
  func.func @transform_4(%arg0: i32) -> (i32, i32) {
    %c0_i32 = arith.constant 0 : i32
    %c0_i32_0 = arith.constant 0 : i32
    return %arg0, %c0_i32 : i32, i32
  }
}

</mosaic_0001>

<bundles_post_ra>
// kernel: transformer_forward.13
= control target key start
LH: loop header
LB: loop body
LE: loop exit
PB: predicated region body
PF: predicated region fallthrough
CT: control target
= control target key end

     0   :  { %vm19_vm0 = vcmask 261120   ;;  %v132_v1 = vmov 0.0   ;;  %vm22_vm1 = vcmask 254976   ;;  %vm102_vm2 = vcmask 257024   ;;  %s183_s1 = inlined_call_operand.vmem [shape: bf16[32,32], index: 1, kind: input, shape index: {}]   ;;  %s184_s0 = inlined_call_operand.vmem [shape: bf16[18,32], index: 0, kind: input, shape index: {}]   ;;  %s185_s2 = inlined_call_operand.vmem [shape: f32[1,32], index: 2, kind: input, shape index: {}]   ;;  %s186_s3 = inlined_call_operand.vmem [shape: bf16[18,32], index: 3, kind: output, shape index: {}]  }
   0x1   :  { %v127_v0 = vld [vmem:[%s183_s1 + $0x8] sm:$0xff]  ;;  %20 = vst.msk [vmem:[#allocation2] sm:$0xff] %vm19_vm0, %v132_v1  ;;  %v126_v3 = vld [vmem:[%s183_s1] sm:$0xff]  ;;  %vm105_vm3 = vcmask 253952  }
   0x2   :  { %v29_v2 = vld [vmem:[%s184_s0 + $0x8] sm:$0x1]  ;;  %21 = vst.msk [vmem:[#allocation2 + $0x8] sm:$0xff] %vm19_vm0, %v132_v1  ;;  %67 = vmatpush.bf16.msra.mxu0 %v127_v0  ;;  %128 = vmatpush.bf16.msra.mxu1 %v127_v0  ;;  %v125_v5 = vld [vmem:[%s184_s0] sm:$0xff] }
   0x3   :  { %v39_v4 = vunpack.c.l.b16 %v29_v2  ;;  %23 = vst.msk [vmem:[#allocation2 + $0x10] sm:$0x3] %vm22_vm1, %v132_v1  ;;  %v131_v14 = vld [vmem:[%s185_s2] ss:$0 sm:$0xff] }
   0x5   :  { %v41_v6 = vpack.c.b16 %v39_v4, %v39_v4 }
   0x6   :  { %68 = vmatpush.bf16.msra.mxu0 %v126_v3  ;;  %129 = vmatpush.bf16.msra.mxu1 %v126_v3 }
   0x8   :  { %v24_v7 = vld [vmem:[#allocation2] sm:$0xff] }
   0x9   :  { %123 = vmatmul.msk.bf16.vlgmr.msra.gmra.mxu0 %vm19_vm0, %v125_v5  ;;  %124 = vmatmul.msk.bf16.vlgmr.msra.gmra.mxu1 %vm19_vm0, %v41_v6  ;;  %v25_v13 = vld [vmem:[#allocation2 + $0x8] sm:$0xff] }
   0xa   :  { %v26_v8 = vld [vmem:[#allocation2 + $0x10] sm:$0x3] }
  0x86   :  { %v70_v9 = vpop.f32.mrf.mxu0  ;;  %v75_v10 = vpop.f32.mrf.mxu1 }
  0x87   :  { %v79_v11 = vadd.f32 %v70_v9, %v24_v7  ;;  %v81_v12 = vadd.f32 %v75_v10, %v26_v8 }
  0x89   :  { %82 = vst.msk [vmem:[#allocation2] sm:$0xff] %vm19_vm0, %v79_v11 }
  0x8a   :  { %85 = vst.msk [vmem:[#allocation2 + $0x10] sm:$0x3] %vm22_vm1, %v81_v12 }
  0x8e   :  { %v72_v15 = vpop.f32.mrf.mxu0  ;;  %v77_v16 = vpop.f32.mrf.mxu1 }
  0x8f   :  { %v80_v17 = vadd.f32 %v72_v15, %v25_v13 }
  0x90   :  { %v89_v18 = vld [vmem:[#allocation2] sm:$0xff] }
  0x91   :  { %v96_v19 = vadd.f32 %v131_v14, %v89_v18  ;;  %v91_v20 = vld [vmem:[#allocation2 + $0x10] sm:$0x3]  ;;  %83 = vst.msk [vmem:[#allocation2 + $0x8] sm:$0xff] %vm19_vm0, %v80_v17 }
  0x92   :  { %v98_v21 = vadd.f32 %v131_v14, %v91_v20 }
  0x93   :  { %v99_v22 = vpack.c.bf16 %v96_v19, %v96_v19 }
  0x94   :  { %v101_v23 = vpack.c.bf16 %v98_v21, %v98_v21 }
  0x95   :  { %103 = vst.msk [vmem:[%s186_s3] sm:$0xf] %vm102_vm2, %v99_v22 }
  0x96   :  { %106 = vst.msk [vmem:[%s186_s3 + $0x8] sm:$0x1] %vm105_vm3, %v101_v23 }
  0x98   :  { %v90_v24 = vld [vmem:[#allocation2 + $0x8] sm:$0xff] }
  0x99   :  { %v97_v25 = vadd.f32 %v131_v14, %v90_v24 }
  0x9b   :  { %v100_v26 = vpack.c.bf16 %v97_v25, %v97_v25 }
  0x9d   :  { %104 = vst.msk [vmem:[%s186_s3 + $0x4] sm:$0xf] %vm102_vm2, %v100_v26 }

// kernel: transformer_forward.11
= control target key start
LH: loop header
LB: loop body
LE: loop exit
PB: predicated region body
PF: predicated region fallthrough
CT: control target
= control target key end

     0   :  { %vm38_vm0 = vcmask 261120   ;;  %vm41_vm1 = vcmask 254976   ;;  %v222_v14 = vmov 32.0   ;;  %vm179_vm12 = vcmask 781312   ;;  %s327_s0 = inlined_call_operand.vmem [shape: bf16[18,32], index: 0, kind: input, shape index: {}]   ;;  %s328_s1 = inlined_call_operand.vmem [shape: f32[18,32], index: 1, kind: input, shape index: {}]   ;;  %s329_s6 = inlined_call_operand.vmem [shape: f32[18,32], index: 6, kind: output, shape index: {0}]   ;;  %s330_s2 = inlined_call_operand.vmem [shape: f32[1,32], index: 2, kind: input, shape index: {}]   ;;  %s331_s3 = inlined_call_operand.vmem [shape: f32[1,32], index: 3, kind: input, shape index: {}]   ;;  %s332_s5 = inlined_call_operand.vmem [shape: f32[1,96], index: 5, kind: input, shape index: {}]   ;;  %s333_s4 = inlined_call_operand.vmem [shape: bf16[32,96], index: 4, kind: input, shape index: {}]   ;;  %s334_s7 = inlined_call_operand.vmem [shape: bf16[18,96], index: 7, kind: output, shape index: {1}]  }
   0x1   :  { %v205_v0 = vld [vmem:[%s327_s0] sm:$0xff]   ;;  %v33_v4 = vld [vmem:[%s328_s1 + $0x8] sm:$0xff]  ;;  %v34_v6 = vld [vmem:[%s328_s1 + $0x10] sm:$0x3]  ;;  %214 = vrcp.f32 %v222_v14  ;;  %vm182_vm13 = vcmask 778240  }
   0x2   :  { %v32_v1 = vld [vmem:[%s328_s1] sm:$0xff]  ;;  %v206_v2 = vunpack.c.l.bf16 %v205_v0  ;;  %v207_v3 = vunpack.c.h.bf16 %v205_v0  ;;  %v28_v5 = vld [vmem:[%s327_s0 + $0x8] sm:$0x1] }
   0x3   :  { %v31_v7 = vunpack.c.l.bf16 %v28_v5  ;;  %v203_v36 = vld [vmem:[%s333_s4 + $0x8] sm:$0xff]  ;;  %v202_v39 = vld [vmem:[%s333_s4] sm:$0xff] }
   0x4   :  { %v35_v8 = vadd.f32 %v206_v2, %v32_v1  ;;  %v36_v9 = vadd.f32 %v207_v3, %v33_v4  ;;  %164 = vmatpush.bf16.msra.mxu0 %v203_v36  ;;  %208 = vmatpush.bf16.msra.mxu1 %v203_v36  ;;  %v211_v61 = vld [vmem:[%s330_s2] ss:$0 sm:$0xff] }
   0x5   :  { %v37_v10 = vadd.f32 %v34_v6, %v31_v7  ;;  %v212_v4 = vld [vmem:[%s331_s3] ss:$0 sm:$0xff] }
   0x6   :  { %v43_v11 = vsel %vm38_vm0, %v35_v8, 0.0  ;;  %39 = vst.msk [vmem:[%s329_s6] sm:$0xff] %vm38_vm0, %v35_v8  ;;  %v46_v13 = vsel %vm38_vm0, %v36_v9, 0.0 }
   0x7   :  { %44 = vadd.xlane.f32.xlu0 %v43_v11  ;;  %v49_v12 = vsel %vm41_vm1, %v37_v10, 0.0  ;;  %40 = vst.msk [vmem:[%s329_s6 + $0x8] sm:$0xff] %vm38_vm0, %v36_v9  ;;  %v215_v15 = vpop.eup %214 }
   0x8   :  { %50 = vadd.xlane.f32.xlu1 %v49_v12  ;;  %42 = vst.msk [vmem:[%s329_s6 + $0x10] sm:$0x3] %vm41_vm1, %v37_v10  ;;  %v53_v16 = vmul.f32 32.0, %v215_v15  ;;  %vm57_vm2 = vweird.f32 %v215_v15  ;;  %165 = vmatpush.bf16.msra.mxu0 %v202_v39 }
   0x9   :  { %209 = vmatpush.bf16.msra.mxu1 %v202_v39 }
   0xa   :  { %v54_v17 = vsub.f32 1.0, %v53_v16 }
   0xc   :  { %v55_v18 = vmul.f32 %v215_v15, %v54_v17  ;;  %v213_v17 = vld [vmem:[%s332_s5] ss:$0 sm:$0xff] }
   0xe   :  { %v56_v19 = vadd.f32 %v215_v15, %v55_v18 }
   0xf   :  { %47 = vadd.xlane.f32.xlu0 %v46_v13 }
  0x10   :  { %v58_v20 = vsel %vm57_vm2, %v215_v15, %v56_v19 }
  0x7a   :  { %v45_v21 = vpop.xlane.xlu0 %44 }
  0x7b   :  { %v59_v22 = vmul.f32 %v58_v20, %v45_v21  ;;  %v51_v25 = vpop.xlane.xlu1 %50 }
  0x7c   :  { %v61_v29 = vmul.f32 %v58_v20, %v51_v25 }
  0x7d   :  { %v62_v23 = vsub.f32 %v35_v8, %v59_v22 }
  0x7e   :  { %v294_v31 = vsub.f32 %v37_v10, %v61_v29 }
  0x7f   :  { %v65_v24 = vmul.f32 %v62_v23, %v62_v23 }
  0x80   :  { %v67_v34 = vmul.f32 %v294_v31, %v294_v31 }
  0x81   :  { %v68_v26 = vsel %vm38_vm0, %v65_v24, 0.0 }
  0x82   :  { %69 = vadd.xlane.f32.xlu1 %v68_v26  ;;  %v48_v27 = vpop.xlane.xlu0 %47  ;;  %v74_v35 = vsel %vm41_vm1, %v67_v34, 0.0 }
  0x83   :  { %v60_v28 = vmul.f32 %v58_v20, %v48_v27 }
  0x85   :  { %v63_v30 = vsub.f32 %v36_v9, %v60_v28 }
  0x87   :  { %v66_v32 = vmul.f32 %v63_v30, %v63_v30 }
  0x89   :  { %v71_v33 = vsel %vm38_vm0, %v66_v32, 0.0 }
  0x8a   :  { %72 = vadd.xlane.f32.xlu2 %v71_v33 }
  0x92   :  { %75 = vadd.xlane.f32.xlu2 %v74_v35 }
  0xf5   :  { %v70_v37 = vpop.xlane.xlu1 %69 }
  0xf6   :  { %v77_v38 = vmul.f32 %v70_v37, %v58_v20 }
  0xf8   :  { %v80_v40 = vadd.f32 1e-06, %v77_v38 }
  0xfa   :  { %216 = vrsqrt.f32 %v80_v40  ;;  %vm89_vm4 = vweird.f32 %v80_v40 }
  0xfd   :  { %v73_v41 = vpop.xlane.xlu2 %72 }
  0xfe   :  { %v78_v42 = vmul.f32 %v73_v41, %v58_v20 }
 0x100   :  { %v217_v43 = vpop.eup %216  ;;  %v81_v44 = vadd.f32 1e-06, %v78_v42 }
 0x101   :  { %v84_v45 = vmul.f32 %v217_v43, %v80_v40  ;;  %vm90_vm3 = vweird.f32 %v217_v43 }
 0x102   :  { %218 = vrsqrt.f32 %v81_v44  ;;  %vm91_vm5 = vmor %vm89_vm4, %vm90_vm3  ;;  %vm99_vm7 = vweird.f32 %v81_v44 }
 0x103   :  { %v85_v46 = vmul.f32 %v217_v43, %v84_v45 }
 0x105   :  { %v86_v47 = vmul.f32 0.5, %v85_v46  ;;  %v76_v48 = vpop.xlane.xlu2 %75 }
 0x106   :  { %v79_v49 = vmul.f32 %v76_v48, %v58_v20 }
 0x107   :  { %v87_v50 = vsub.f32 1.5, %v86_v47 }
 0x108   :  { %v219_v51 = vpop.eup %218  ;;  %v82_v52 = vadd.f32 1e-06, %v79_v49 }
 0x109   :  { %v88_v53 = vmul.f32 %v217_v43, %v87_v50  ;;  %v94_v54 = vmul.f32 %v219_v51, %v81_v44  ;;  %vm100_vm6 = vweird.f32 %v219_v51 }
 0x10a   :  { %220 = vrsqrt.f32 %v82_v52  ;;  %vm101_vm8 = vmor %vm99_vm7, %vm100_vm6  ;;  %vm109_vm10 = vweird.f32 %v82_v52 }
 0x10b   :  { %v95_v55 = vmul.f32 %v219_v51, %v94_v54  ;;  %v92_v56 = vsel %vm91_vm5, %v217_v43, %v88_v53 }
 0x10c   :  { %v113_v60 = vmul.f32 %v92_v56, %v62_v23 }
 0x10d   :  { %v96_v57 = vmul.f32 0.5, %v95_v55 }
 0x10e   :  { %v120_v3 = vmul.f32 %v211_v61, %v113_v60 }
 0x10f   :  { %v97_v58 = vsub.f32 1.5, %v96_v57 }
 0x110   :  { %v221_v59 = vpop.eup %220  ;;  %v127_v8 = vadd.f32 %v212_v4, %v120_v3 }
 0x111   :  { %v98_v62 = vmul.f32 %v219_v51, %v97_v58  ;;  %v104_v63 = vmul.f32 %v221_v59, %v82_v52  ;;  %vm110_vm9 = vweird.f32 %v221_v59 }
 0x112   :  { %vm111_vm11 = vmor %vm109_vm10, %vm110_vm9 }
 0x113   :  { %v102_v0 = vsel %vm101_vm8, %v219_v51, %v98_v62  ;;  %v105_v1 = vmul.f32 %v221_v59, %v104_v63 }
 0x114   :  { %v114_v2 = vmul.f32 %v102_v0, %v63_v30 }
 0x115   :  { %v106_v5 = vmul.f32 0.5, %v105_v1 }
 0x116   :  { %v121_v6 = vmul.f32 %v211_v61, %v114_v2 }
 0x117   :  { %v107_v7 = vsub.f32 1.5, %v106_v5 }
 0x118   :  { %v128_v9 = vadd.f32 %v212_v4, %v121_v6 }
 0x119   :  { %v108_v10 = vmul.f32 %v221_v59, %v107_v7 }
 0x11a   :  { %v130_v11 = vpack.c.bf16 %v128_v9, %v127_v8 }
 0x11b   :  { %v112_v12 = vsel %vm111_vm11, %v221_v59, %v108_v10 }
 0x11c   :  { %200 = vmatmul.msk.bf16.vlgmr.msra.gmra.mxu0 %vm38_vm0, %v130_v11  ;;  %v115_v13 = vmul.f32 %v112_v12, %v294_v31 }
 0x11e   :  { %v122_v14 = vmul.f32 %v211_v61, %v115_v13 }
 0x120   :  { %v129_v15 = vadd.f32 %v212_v4, %v122_v14 }
 0x122   :  { %v131_v16 = vpack.c.bf16 %v129_v15, %v129_v15 }
 0x124   :  { %201 = vmatmul.msk.bf16.vlgmr.msra.gmra.mxu1 %vm38_vm0, %v131_v16 }
 0x199   :  { %v167_v18 = vpop.f32.mrf.mxu0 }
 0x19a   :  { %v168_v19 = vadd.f32 %v213_v17, %v167_v18 }
 0x19c   :  { %v176_v20 = vpack.c.bf16 %v168_v19, %v168_v19 }
 0x19e   :  { %180 = vst.msk [vmem:[%s334_s7] sm:$0xf] %vm179_vm12, %v176_v20 }
 0x1a1   :  { %v169_v21 = vpop.f32.mrf.mxu0  ;;  %v172_v22 = vpop.f32.mrf.mxu1 }
 0x1a2   :  { %v170_v23 = vadd.f32 %v213_v17, %v169_v21  ;;  %v173_v24 = vadd.f32 %v213_v17, %v172_v22 }
 0x1a4   :  { %v177_v25 = vpack.c.bf16 %v170_v23, %v170_v23  ;;  %v178_v26 = vpack.c.bf16 %v173_v24, %v173_v24 }
 0x1a6   :  { %181 = vst.msk [vmem:[%s334_s7 + $0x4] sm:$0xf] %vm179_vm12, %v177_v25 }
 0x1a7   :  { %183 = vst.msk [vmem:[%s334_s7 + $0x8] sm:$0x1] %vm182_vm13, %v178_v26 }
 0x1a9   :  { %v174_v27 = vpop.f32.mrf.mxu1 }

// kernel: transformer_forward.12
= control target key start
LH: loop header
LB: loop body
LE: loop exit
PB: predicated region body
PF: predicated region fallthrough
CT: control target
= control target key end

     0   :  { %s640_s6 = smov 0   ;;  %s720_s0 = inlined_call_operand.vmem [shape: bf16[2,9,96], index: 0, kind: input, shape index: {}]   ;;  %s721_s1 = inlined_call_operand.vmem [shape: bf16[2,9,32], index: 1, kind: output, shape index: {}]  }
   0x1 LB: > { %s511_s7 = sadd.s32 4294967295, %s613_s6   ;;  %p515_p0 = scmp.ge.s32.totalorder %s613_s6, 1  ;;  %s613_s6 = sphi %s640_s6, %s11_s6  }
   0x2   : > { %p87_p1 = scmp.lt.s32.totalorder %s613_s6, 3 }
   0x4   : > { %p88_p2 = pnand %p515_p0, %p87_p1 }
   0x5   : > { %p107_p3 = scmp.lt.s32.totalorder (!%p88_p2), %s511_s7, 1  ;;  %s615_s12 = smov (!%p88_p2), 96  }
   0x6   : > { %91 = sbr.rel (%p88_p2) target bundleno = 1233 (0x4d1), region = 24  ;;  %s616_s13 = smov (!%p88_p2), 120  }
   0x7   : > { %s617_s14 = smov (!%p88_p2), 80   ;;  %s618_s15 = smov (!%p88_p2), 88  }
   0x8   : > { %s619_s16 = smov (!%p88_p2), 64   ;;  %s620_s17 = smov (!%p88_p2), 72  }
   0x9   : > { %s621_s18 = smov (!%p88_p2), 104   ;;  %s623_s19 = smov (!%p88_p2), 112  }
   0xa   : > { %s624_s20 = smov (!%p88_p2), 56   ;;  %s625_s21 = smov (!%p88_p2), 48  }
   0xb   : > { %s723_s7 = smov (!%p107_p3, %s511_s7), 1  ;;  %vm127_vm0 = vcmask 64512   ;;  %vm150_vm1 = vcmask 72704   ;;  %vm154_vm2 = vcmask 65536   ;;  %vm180_vm3 = vcmask 1043456   ;;  %s626_s22 = smov 40  }
   0xc   : > { %s534_s8 = sshll.u32 %s723_s7, 3  ;;  %vm181_vm4 = vcmask 1044480   ;;  %v622_v24 = vmov 65535   ;;  %s627_s23 = smov 8   ;;  %vm440_vm5 = vcmask 130048   ;;  %vm443_vm6 = vcmask 195584  }
   0xd   : > { %s111_s11 = scalar_lea.vmem %s720_s0, %s534_s8  ;;  %v182_v25 = vsel %vm180_vm3, 4294967295, %v622_v24  ;;  %s628_s24 = smov 16   ;;  %vm450_vm7 = vcmask 253952   ;;  %vm451_vm8 = vsmask.f32 256  ;;  %vm448_vm9 = vcmask 257024  }
   0xe   : > { %v522_v0 = vld [vmem:[%s111_s11] sm:$0xf]  ;;  %v536_v1 = vld [vmem:[%s111_s11] sm:$0x10]  ;;  %v673_v27 = vsel %vm181_vm4, %v182_v25, 0  ;;  %s629_s25 = smov 24   ;;  %s116_s28 = scalar_lea.vmem %s721_s1, %s534_s8  ;;  %vm452_vm10 = vmand %vm450_vm7, %vm451_vm8 }
   0xf   : > { %v656_v2 = vor.u32 %v536_v1, %v522_v0 }
  0x11   : > { %125 = vrot.lane.b32.xlu0 %v656_v2, %s615_s12  ;;  %201 = vrot.lane.b32.xlu2 %v656_v2, %s616_s13 }
  0x19   : > { %274 = vrot.lane.b32.xlu2 %v656_v2, %s617_s14 }
  0x6b   : > { %v202_v21 = vpop.permute.xlu2 %201 }
  0x73   : > { %v275_v26 = vpop.permute.xlu2 %274 }
  0x74   : > { %v280_v30 = vsel %vm127_vm0, %v275_v26, 0 }
  0x83   : > { %v126_v3 = vpop.permute.xlu0 %125 }
  0x84   : > { %v132_v4 = vsel %vm127_vm0, %v126_v3, 0 }
  0x85   : > { %141 = vmatpush.bf16.xpose.msra.mxu0 %v132_v4 }
  0x8c   : > { %524 = vmatmul.msk.bf16.vlgmr.msra.gmra.mxu0 %vm127_vm0, %v656_v2 }
 0x109   : > { %v143_v5 = vpop.f32.mrf.mxu0 }
 0x10a   : > { %v148_v6 = vmul.f32 0.35355338, %v143_v5 }
 0x10c   : > { %v151_v7 = vsel %vm150_vm1, %v148_v6, -inf }
 0x10d   : > { %152 = vmax.xlane.f32.xlu0 %v151_v7 }
 0x111   : > { %v145_v8 = vpop.f32.mrf.mxu0 }
 0x112   : > { %v149_v9 = vmul.f32 0.35355338, %v145_v8 }
 0x114   : > { %v155_v10 = vsel %vm154_vm2, %v149_v9, -inf }
 0x115   : > { %156 = vmax.xlane.f32.xlu1 %v155_v10 }
 0x12e   : > { %203 = vrot.lane.b32.xlu1 %v656_v2, %s618_s15 }
 0x136   : > { %175 = vrot.lane.b32.xlu1 %v656_v2, %s619_s16 }
 0x13e   : > { %345 = vrot.lane.b32.xlu1 %v656_v2, %s620_s17 }
 0x146   : > { %343 = vrot.lane.b32.xlu1 %v656_v2, %s621_s18 }
 0x180   : > { %v153_v11 = vpop.xlane.xlu0 %152 }
 0x181   : > { %v158_v12 = vsub.f32 %v148_v6, %v153_v11 }
 0x183   : > { %v160_v13 = vmul.f32 1.442695, %v158_v12 }
 0x185   : > { %575 = vpow2.f32 %v160_v13 }
 0x188   : > { %v157_v14 = vpop.xlane.xlu1 %156 }
 0x189   : > { %v159_v15 = vsub.f32 %v149_v9, %v157_v14 }
 0x18b   : > { %v576_v16 = vpop.eup %575  ;;  %v162_v17 = vmul.f32 1.442695, %v159_v15 }
 0x18c   : > { %v164_v18 = vsel %vm150_vm1, %v576_v16, 0.0 }
 0x18d   : > { %577 = vpow2.f32 %v162_v17  ;;  %165 = vadd.xlane.f32.xlu2 %v164_v18 }
 0x193   : > { %v578_v19 = vpop.eup %577 }
 0x194   : > { %v167_v20 = vsel %vm154_vm2, %v578_v19, 0.0 }
 0x195   : > { %168 = vadd.xlane.f32.xlu2 %v167_v20 }
 0x1a0   : > { %v204_v22 = vpop.permute.xlu1 %203 }
 0x1a1   : > { %v209_v23 = vsel %vm127_vm0, %v204_v22, 0 }
 0x1a2   : > { %218 = vmatpush.bf16.xpose.msra.mxu2 %v209_v23 }
 0x1a8   : > { %v176_v28 = vpop.permute.xlu1 %175 }
 0x1a9   : > { %526 = vmatmul.msk.bf16.vlgmr.msra.gmra.mxu2 %vm127_vm0, %v202_v21  ;;  %v185_v29 = vand.u32 %v673_v27, %v176_v28 }
 0x1ab   : > { %194 = vmatpush.bf16.msra.mxu1 %v185_v29 }
 0x1ad   : > { %272 = vrot.lane.b32.xlu2 %v656_v2, %s623_s19 }
 0x1af   : > { %289 = vmatpush.bf16.xpose.msrb.mxu1 %v280_v30 }
 0x1b0   : > { %v346_v31 = vpop.permute.xlu1 %345 }
 0x1b1   : > { %v351_v32 = vsel %vm127_vm0, %v346_v31, 0 }
 0x1b2   : > { %360 = vmatpush.bf16.xpose.msrb.mxu0 %v351_v32 }
 0x1b8   : > { %v344_v33 = vpop.permute.xlu1 %343 }
 0x1b9   : > { %530 = vmatmul.msk.bf16.vlgmr.msrb.gmra.mxu0 %vm127_vm0, %v344_v33 }
 0x200   : > { %v166_v34 = vpop.xlane.xlu2 %165 }
 0x201   : > { %579 = vrcp.f32 %v166_v34 }
 0x207   : > { %v580_v36 = vpop.eup %579 }
 0x208   : > { %v169_v35 = vpop.xlane.xlu2 %168  ;;  %v172_v38 = vmul.f32 %v580_v36, %v576_v16 }
 0x209   : > { %581 = vrcp.f32 %v169_v35 }
 0x20f   : > { %v582_v37 = vpop.eup %581 }
 0x210   : > { %v173_v39 = vmul.f32 %v582_v37, %v578_v19  ;;  %v273_v41 = vpop.permute.xlu2 %272 }
 0x212   : > { %v174_v40 = vpack.c.bf16 %v173_v39, %v172_v38 }
 0x214   : > { %525 = vmatmul.msk.bf16.vlgmr.msra.gmra.mxu1 %vm150_vm1, %v174_v40 }
 0x224   : > { %528 = vmatmul.msk.bf16.vlgmr.msrb.gmra.mxu1 %vm127_vm0, %v273_v41 }
 0x22c   : > { %v220_v42 = vpop.f32.mrf.mxu2 }
 0x22d   : > { %v225_v43 = vmul.f32 0.35355338, %v220_v42 }
 0x22f   : > { %v227_v44 = vsel %vm150_vm1, %v225_v43, -inf }
 0x230   : > { %228 = vmax.xlane.f32.xlu0 %v227_v44 }
 0x234   : > { %v222_v45 = vpop.f32.mrf.mxu2 }
 0x235   : > { %v226_v46 = vmul.f32 0.35355338, %v222_v45 }
 0x236   : > { %v362_v47 = vpop.f32.mrf.mxu0 }
 0x237   : > { %v367_v48 = vmul.f32 0.35355338, %v362_v47  ;;  %v230_v49 = vsel %vm154_vm2, %v226_v46, -inf }
 0x238   : > { %231 = vmax.xlane.f32.xlu2 %v230_v49 }
 0x239   : > { %v369_v50 = vsel %vm150_vm1, %v367_v48, -inf }
 0x23a   : > { %370 = vmax.xlane.f32.xlu0 %v369_v50 }
 0x23e   : > { %v364_v51 = vpop.f32.mrf.mxu0 }
 0x23f   : > { %v368_v52 = vmul.f32 0.35355338, %v364_v51 }
 0x241   : > { %v372_v53 = vsel %vm154_vm2, %v368_v52, -inf }
 0x242   : > { %373 = vmax.xlane.f32.xlu0 %v372_v53 }
 0x250   : > { %250 = vrot.lane.b32.xlu2 %v656_v2, %s624_s20 }
 0x291   : > { %v688_v54 = vpop.f32.mrf.mxu1 }
 0x299   : > { %v690_v55 = vpop.f32.mrf.mxu1 }
 0x2a1   : > { %v291_v56 = vpop.f32.mrf.mxu1 }
 0x2a2   : > { %v296_v57 = vmul.f32 0.35355338, %v291_v56 }
 0x2a3   : > { %v229_v58 = vpop.xlane.xlu0 %228 }
 0x2a4   : > { %v233_v59 = vsub.f32 %v225_v43, %v229_v58  ;;  %v298_v60 = vsel %vm150_vm1, %v296_v57, -inf }
 0x2a5   : > { %299 = vmax.xlane.f32.xlu1 %v298_v60 }
 0x2a6   : > { %v235_v61 = vmul.f32 1.442695, %v233_v59 }
 0x2a8   : > { %583 = vpow2.f32 %v235_v61 }
 0x2a9   : > { %v293_v4 = vpop.f32.mrf.mxu1 }
 0x2aa   : > { %v297_v6 = vmul.f32 0.35355338, %v293_v4 }
 0x2ab   : > { %v232_v62 = vpop.xlane.xlu2 %231 }
 0x2ac   : > { %v234_v1 = vsub.f32 %v226_v46, %v232_v62  ;;  %v301_v10 = vsel %vm154_vm2, %v297_v6, -inf }
 0x2ad   : > { %v371_v63 = vpop.xlane.xlu0 %370 }
 0x2ae   : > { %v584_v0 = vpop.eup %583  ;;  %v237_v5 = vmul.f32 1.442695, %v234_v1  ;;  %v375_v8 = vsub.f32 %v367_v48, %v371_v63 }
 0x2af   : > { %v239_v3 = vsel %vm150_vm1, %v584_v0, 0.0 }
 0x2b0   : > { %240 = vadd.xlane.f32.xlu0 %v239_v3  ;;  %585 = vpow2.f32 %v237_v5  ;;  %v377_v12 = vmul.f32 1.442695, %v375_v8 }
 0x2b3   : > { %v251_v21 = vpop.permute.xlu2 %250 }
 0x2b4   : > { %v256_v22 = vand.u32 %v251_v21, %v673_v27 }
 0x2b5   : > { %v374_v7 = vpop.xlane.xlu0 %373 }
 0x2b6   : > { %v376_v9 = vsub.f32 %v368_v52, %v374_v7  ;;  %v586_v13 = vpop.eup %585  ;;  %265 = vmatpush.bf16.msra.mxu3 %v256_v22 }
 0x2b7   : > { %v242_v14 = vsel %vm154_vm2, %v586_v13, 0.0 }
 0x2b8   : > { %v379_v11 = vmul.f32 1.442695, %v376_v9  ;;  %302 = vmax.xlane.f32.xlu0 %v301_v10 }
 0x2ba   : > { %587 = vpow2.f32 %v379_v11 }
 0x2bb   : > { %589 = vpow2.f32 %v377_v12 }
 0x2c0   : > { %v588_v15 = vpop.eup %587  ;;  %243 = vadd.xlane.f32.xlu0 %v242_v14 }
 0x2c1   : > { %v384_v16 = vsel %vm154_vm2, %v588_v15, 0.0  ;;  %v590_v17 = vpop.eup %589 }
 0x2c2   : > { %385 = vadd.xlane.f32.xlu1 %v384_v16  ;;  %v381_v18 = vsel %vm150_vm1, %v590_v17, 0.0  ;;  %v453_v16 = vld [vmem:[%s116_s28 + $0x4] sm:$0x1] }
 0x2c8   : > { %382 = vadd.xlane.f32.xlu0 %v381_v18 }
 0x318   : > { %v300_v19 = vpop.xlane.xlu1 %299 }
 0x319   : > { %v304_v20 = vsub.f32 %v296_v57, %v300_v19 }
 0x31b   : > { %v306_v23 = vmul.f32 1.442695, %v304_v20 }
 0x31d   : > { %591 = vpow2.f32 %v306_v23 }
 0x323   : > { %v592_v24 = vpop.eup %591  ;;  %v241_v25 = vpop.xlane.xlu0 %240 }
 0x324   : > { %v310_v26 = vsel %vm150_vm1, %v592_v24, 0.0 }
 0x325   : > { %311 = vadd.xlane.f32.xlu0 %v310_v26 }
 0x32b   : > { %v303_v28 = vpop.xlane.xlu0 %302 }
 0x32c   : > { %v305_v29 = vsub.f32 %v297_v6, %v303_v28 }
 0x32e   : > { %v308_v30 = vmul.f32 1.442695, %v305_v29 }
 0x330   : > { %593 = vpow2.f32 %v308_v30 }
 0x331   : > { %595 = vrcp.f32 %v241_v25 }
 0x333   : > { %v244_v31 = vpop.xlane.xlu0 %243 }
 0x334   : > { %597 = vrcp.f32 %v244_v31 }
 0x335   : > { %v386_v40 = vpop.xlane.xlu1 %385 }
 0x336   : > { %v594_v32 = vpop.eup %593 }
 0x337   : > { %v313_v33 = vsel %vm154_vm2, %v594_v32, 0.0  ;;  %v596_v34 = vpop.eup %595 }
 0x338   : > { %314 = vadd.xlane.f32.xlu1 %v313_v33  ;;  %v247_v36 = vmul.f32 %v596_v34, %v584_v0 }
 0x339   : > { %321 = vrot.lane.b32.xlu0 %v656_v2, %s625_s21 }
 0x33a   : > { %v598_v35 = vpop.eup %597 }
 0x33b   : > { %v248_v37 = vmul.f32 %v598_v35, %v586_v13  ;;  %v383_v39 = vpop.xlane.xlu0 %382 }
 0x33d   : > { %v249_v38 = vpack.c.bf16 %v248_v37, %v247_v36 }
 0x33f   : > { %527 = vmatmul.msk.bf16.vlgmr.msra.gmra.mxu3 %vm150_vm1, %v249_v38 }
 0x351   : > { %392 = vrot.lane.b32.xlu1 %v656_v2, %s626_s22 }
 0x398   : > { %v312_v41 = vpop.xlane.xlu0 %311 }
 0x399   : > { %599 = vrcp.f32 %v312_v41 }
 0x39f   : > { %v600_v45 = vpop.eup %599 }
 0x3a0   : > { %v318_v47 = vmul.f32 %v600_v45, %v592_v24 }
 0x3ab   : > { %v315_v42 = vpop.xlane.xlu1 %314  ;;  %v322_v43 = vpop.permute.xlu0 %321 }
 0x3ac   : > { %601 = vrcp.f32 %v315_v42  ;;  %v327_v44 = vand.u32 %v322_v43, %v673_v27 }
 0x3ad   : > { %603 = vrcp.f32 %v383_v39 }
 0x3ae   : > { %336 = vmatpush.bf16.msrb.mxu3 %v327_v44  ;;  %605 = vrcp.f32 %v386_v40 }
 0x3b2   : > { %v602_v46 = vpop.eup %601 }
 0x3b3   : > { %v319_v48 = vmul.f32 %v602_v46, %v594_v32  ;;  %v604_v2 = vpop.eup %603 }
 0x3b4   : > { %v606_v50 = vpop.eup %605  ;;  %v389_v52 = vmul.f32 %v604_v2, %v590_v17 }
 0x3b5   : > { %v320_v49 = vpack.c.bf16 %v319_v48, %v318_v47  ;;  %v390_v57 = vmul.f32 %v606_v50, %v588_v15 }
 0x3b7   : > { %529 = vmatmul.msk.bf16.vlgmr.msrb.gmra.mxu3 %vm150_vm1, %v320_v49  ;;  %v391_v58 = vpack.c.bf16 %v390_v57, %v389_v52 }
 0x3c2   : > { %v267_v51 = vpop.f32.mrf.mxu3 }
 0x3c3   : > { %v393_v53 = vpop.permute.xlu1 %392 }
 0x3c4   : > { %v398_v56 = vand.u32 %v393_v53, %v673_v27 }
 0x3c6   : > { %407 = vmatpush.bf16.msrb.mxu2 %v398_v56 }
 0x3c9   : > { %531 = vmatmul.msk.bf16.vlgmr.msrb.gmra.mxu2 %vm150_vm1, %v391_v58 }
 0x3ca   : > { %v269_v59 = vpop.f32.mrf.mxu3 }
 0x3cb   : > { %v560_v60 = vpack.i.bf16 %v267_v51, %v269_v59 }
 0x3cd   : > { %561 = vrot.lane.b32.xlu2 %v560_v60, %s627_s23 }
 0x427   : > { %v562_v27 = vpop.permute.xlu2 %561 }
 0x428   : > { %v564_v5 = vunpack.i.h.bf16 %v562_v27  ;;  %v563_v6 = vunpack.i.l.bf16 %v562_v27 }
 0x42a   : > { %v438_v10 = vsel %vm127_vm0, %v688_v54, %v564_v5  ;;  %v439_v11 = vsel %vm127_vm0, %v690_v55, %v563_v6 }
 0x43a   : > { %v338_v61 = vpop.f32.mrf.mxu3 }
 0x442   : > { %v340_v62 = vpop.f32.mrf.mxu3 }
 0x443   : > { %v565_v63 = vpack.i.bf16 %v338_v61, %v340_v62 }
 0x445   : > { %566 = vrot.lane.b32.xlu2 %v565_v63, %s628_s24 }
 0x44c   : > { %v409_v0 = vpop.f32.mrf.mxu2 }
 0x454   : > { %v411_v1 = vpop.f32.mrf.mxu2 }
 0x455   : > { %v570_v3 = vpack.i.bf16 %v409_v0, %v411_v1 }
 0x457   : > { %571 = vrot.lane.b32.xlu0 %v570_v3, %s629_s25 }
 0x49f   : > { %v567_v4 = vpop.permute.xlu2 %566 }
 0x4a0   : > { %v569_v7 = vunpack.i.h.bf16 %v567_v4  ;;  %v568_v8 = vunpack.i.l.bf16 %v567_v4 }
 0x4a2   : > { %v441_v14 = vsel %vm440_vm5, %v438_v10, %v569_v7  ;;  %v442_v15 = vsel %vm440_vm5, %v439_v11, %v568_v8 }
 0x4c9   : > { %v572_v9 = vpop.permute.xlu0 %571 }
 0x4ca   : > { %v574_v12 = vunpack.i.h.bf16 %v572_v9  ;;  %v573_v13 = vunpack.i.l.bf16 %v572_v9 }
 0x4cc   : > { %v444_v17 = vsel %vm443_vm6, %v441_v14, %v574_v12  ;;  %v445_v18 = vsel %vm443_vm6, %v442_v15, %v573_v13 }
 0x4cd   : > { %v446_v19 = vpack.c.bf16 %v444_v17, %v444_v17  ;;  %v447_v20 = vpack.c.bf16 %v445_v18, %v445_v18 }
 0x4cf   : > { %449 = vst.msk [vmem:[%s116_s28] sm:$0xf] %vm448_vm9, %v446_v19  ;;  %v454_v21 = vsel %vm452_vm10, %v447_v20, %v453_v16 }
 0x4d0   : > { %455 = vst [vmem:[%s116_s28 + $0x4] sm:$0x1] %v454_v21 }
 0x4d1 PF: > { %s11_s6 = sadd.s32 1, %s613_s6  }
 0x4d2   : > { %p8_p4 = scmp.ge.s32.totalorder %s11_s6, 4  }
 0x4d4   :  { %10 = sbr.rel (!%p8_p4) target bundleno = 1 (0x1), region = 54 }

// kernel: transformer_forward.14
= control target key start
LH: loop header
LB: loop body
LE: loop exit
PB: predicated region body
PF: predicated region fallthrough
CT: control target
= control target key end

     0   :  { %vm38_vm0 = vcmask 261120   ;;  %vm41_vm1 = vcmask 254976   ;;  %v357_v14 = vmov 32.0   ;;  %s493_s0 = inlined_call_operand.vmem [shape: bf16[18,32], index: 0, kind: input, shape index: {}]   ;;  %s494_s1 = inlined_call_operand.vmem [shape: f32[18,32], index: 1, kind: input, shape index: {}]   ;;  %s495_s6 = inlined_call_operand.vmem [shape: f32[18,32], index: 6, kind: output, shape index: {0}]   ;;  %s496_s2 = inlined_call_operand.vmem [shape: f32[1,32], index: 2, kind: input, shape index: {}]   ;;  %s497_s3 = inlined_call_operand.vmem [shape: f32[1,32], index: 3, kind: input, shape index: {}]   ;;  %s498_s5 = inlined_call_operand.vmem [shape: f32[1,128], index: 5, kind: input, shape index: {}]   ;;  %s499_s4 = inlined_call_operand.vmem [shape: bf16[32,128], index: 4, kind: input, shape index: {}]   ;;  %s500_s7 = inlined_call_operand.vmem [shape: bf16[18,128], index: 7, kind: output, shape index: {1}]  }
   0x1   :  { %v323_v0 = vld [vmem:[%s493_s0] sm:$0xff]   ;;  %v33_v4 = vld [vmem:[%s494_s1 + $0x8] sm:$0xff]  ;;  %v34_v6 = vld [vmem:[%s494_s1 + $0x10] sm:$0x3]  ;;  %337 = vrcp.f32 %v357_v14 }
   0x2   :  { %v32_v1 = vld [vmem:[%s494_s1] sm:$0xff]  ;;  %v324_v2 = vunpack.c.l.bf16 %v323_v0  ;;  %v325_v3 = vunpack.c.h.bf16 %v323_v0  ;;  %v28_v5 = vld [vmem:[%s493_s0 + $0x8] sm:$0x1] }
   0x3   :  { %v31_v7 = vunpack.c.l.bf16 %v28_v5  ;;  %v321_v36 = vld [vmem:[%s499_s4 + $0x8] sm:$0xff]  ;;  %v320_v39 = vld [vmem:[%s499_s4] sm:$0xff] }
   0x4   :  { %v35_v8 = vadd.f32 %v324_v2, %v32_v1  ;;  %v36_v9 = vadd.f32 %v325_v3, %v33_v4  ;;  %164 = vmatpush.bf16.msra.mxu0 %v321_v36  ;;  %331 = vmatpush.bf16.msra.mxu1 %v321_v36  ;;  %v334_v61 = vld [vmem:[%s496_s2] ss:$0 sm:$0xff] }
   0x5   :  { %v37_v10 = vadd.f32 %v34_v6, %v31_v7  ;;  %v335_v4 = vld [vmem:[%s497_s3] ss:$0 sm:$0xff] }
   0x6   :  { %v43_v11 = vsel %vm38_vm0, %v35_v8, 0.0  ;;  %39 = vst.msk [vmem:[%s495_s6] sm:$0xff] %vm38_vm0, %v35_v8  ;;  %v46_v13 = vsel %vm38_vm0, %v36_v9, 0.0 }
   0x7   :  { %44 = vadd.xlane.f32.xlu0 %v43_v11  ;;  %v49_v12 = vsel %vm41_vm1, %v37_v10, 0.0  ;;  %40 = vst.msk [vmem:[%s495_s6 + $0x8] sm:$0xff] %vm38_vm0, %v36_v9  ;;  %v338_v15 = vpop.eup %337 }
   0x8   :  { %50 = vadd.xlane.f32.xlu1 %v49_v12  ;;  %42 = vst.msk [vmem:[%s495_s6 + $0x10] sm:$0x3] %vm41_vm1, %v37_v10  ;;  %v53_v16 = vmul.f32 32.0, %v338_v15  ;;  %vm57_vm2 = vweird.f32 %v338_v15  ;;  %165 = vmatpush.bf16.msra.mxu0 %v320_v39 }
   0x9   :  { %332 = vmatpush.bf16.msra.mxu1 %v320_v39 }
   0xa   :  { %v54_v17 = vsub.f32 1.0, %v53_v16 }
   0xc   :  { %v55_v18 = vmul.f32 %v338_v15, %v54_v17  ;;  %v336_v17 = vld [vmem:[%s498_s5] ss:$0 sm:$0xff] }
   0xe   :  { %v56_v19 = vadd.f32 %v338_v15, %v55_v18 }
   0xf   :  { %47 = vadd.xlane.f32.xlu0 %v46_v13 }
  0x10   :  { %v58_v20 = vsel %vm57_vm2, %v338_v15, %v56_v19 }
  0x7a   :  { %v45_v21 = vpop.xlane.xlu0 %44 }
  0x7b   :  { %v59_v22 = vmul.f32 %v58_v20, %v45_v21  ;;  %v51_v25 = vpop.xlane.xlu1 %50 }
  0x7c   :  { %v61_v29 = vmul.f32 %v58_v20, %v51_v25 }
  0x7d   :  { %v62_v23 = vsub.f32 %v35_v8, %v59_v22 }
  0x7e   :  { %v429_v31 = vsub.f32 %v37_v10, %v61_v29 }
  0x7f   :  { %v65_v24 = vmul.f32 %v62_v23, %v62_v23 }
  0x80   :  { %v67_v34 = vmul.f32 %v429_v31, %v429_v31 }
  0x81   :  { %v68_v26 = vsel %vm38_vm0, %v65_v24, 0.0 }
  0x82   :  { %69 = vadd.xlane.f32.xlu1 %v68_v26  ;;  %v48_v27 = vpop.xlane.xlu0 %47  ;;  %v74_v35 = vsel %vm41_vm1, %v67_v34, 0.0 }
  0x83   :  { %v60_v28 = vmul.f32 %v58_v20, %v48_v27 }
  0x85   :  { %v63_v30 = vsub.f32 %v36_v9, %v60_v28 }
  0x87   :  { %v66_v32 = vmul.f32 %v63_v30, %v63_v30 }
  0x89   :  { %v71_v33 = vsel %vm38_vm0, %v66_v32, 0.0 }
  0x8a   :  { %72 = vadd.xlane.f32.xlu2 %v71_v33 }
  0x92   :  { %75 = vadd.xlane.f32.xlu2 %v74_v35 }
  0xf5   :  { %v70_v37 = vpop.xlane.xlu1 %69 }
  0xf6   :  { %v77_v38 = vmul.f32 %v70_v37, %v58_v20 }
  0xf8   :  { %v80_v40 = vadd.f32 1e-06, %v77_v38 }
  0xfa   :  { %339 = vrsqrt.f32 %v80_v40  ;;  %vm89_vm4 = vweird.f32 %v80_v40 }
  0xfd   :  { %v73_v41 = vpop.xlane.xlu2 %72 }
  0xfe   :  { %v78_v42 = vmul.f32 %v73_v41, %v58_v20 }
 0x100   :  { %v340_v43 = vpop.eup %339  ;;  %v81_v44 = vadd.f32 1e-06, %v78_v42 }
 0x101   :  { %v84_v45 = vmul.f32 %v340_v43, %v80_v40  ;;  %vm90_vm3 = vweird.f32 %v340_v43 }
 0x102   :  { %341 = vrsqrt.f32 %v81_v44  ;;  %vm91_vm5 = vmor %vm89_vm4, %vm90_vm3  ;;  %vm99_vm7 = vweird.f32 %v81_v44 }
 0x103   :  { %v85_v46 = vmul.f32 %v340_v43, %v84_v45 }
 0x105   :  { %v86_v47 = vmul.f32 0.5, %v85_v46  ;;  %v76_v48 = vpop.xlane.xlu2 %75 }
 0x106   :  { %v79_v49 = vmul.f32 %v76_v48, %v58_v20 }
 0x107   :  { %v87_v50 = vsub.f32 1.5, %v86_v47 }
 0x108   :  { %v342_v51 = vpop.eup %341  ;;  %v82_v52 = vadd.f32 1e-06, %v79_v49 }
 0x109   :  { %v88_v53 = vmul.f32 %v340_v43, %v87_v50  ;;  %v94_v54 = vmul.f32 %v342_v51, %v81_v44  ;;  %vm100_vm6 = vweird.f32 %v342_v51 }
 0x10a   :  { %343 = vrsqrt.f32 %v82_v52  ;;  %vm101_vm8 = vmor %vm99_vm7, %vm100_vm6  ;;  %vm109_vm10 = vweird.f32 %v82_v52 }
 0x10b   :  { %v95_v55 = vmul.f32 %v342_v51, %v94_v54  ;;  %v92_v56 = vsel %vm91_vm5, %v340_v43, %v88_v53 }
 0x10c   :  { %v113_v60 = vmul.f32 %v92_v56, %v62_v23 }
 0x10d   :  { %v96_v57 = vmul.f32 0.5, %v95_v55 }
 0x10e   :  { %v120_v3 = vmul.f32 %v334_v61, %v113_v60 }
 0x10f   :  { %v97_v58 = vsub.f32 1.5, %v96_v57 }
 0x110   :  { %v344_v59 = vpop.eup %343  ;;  %v127_v8 = vadd.f32 %v335_v4, %v120_v3 }
 0x111   :  { %v98_v62 = vmul.f32 %v342_v51, %v97_v58  ;;  %v104_v63 = vmul.f32 %v344_v59, %v82_v52  ;;  %vm110_vm9 = vweird.f32 %v344_v59 }
 0x112   :  { %vm111_vm11 = vmor %vm109_vm10, %vm110_vm9 }
 0x113   :  { %v102_v0 = vsel %vm101_vm8, %v342_v51, %v98_v62  ;;  %v105_v1 = vmul.f32 %v344_v59, %v104_v63 }
 0x114   :  { %v114_v2 = vmul.f32 %v102_v0, %v63_v30 }
 0x115   :  { %v106_v5 = vmul.f32 0.5, %v105_v1 }
 0x116   :  { %v121_v6 = vmul.f32 %v334_v61, %v114_v2 }
 0x117   :  { %v107_v7 = vsub.f32 1.5, %v106_v5 }
 0x118   :  { %v128_v9 = vadd.f32 %v335_v4, %v121_v6 }
 0x119   :  { %v108_v10 = vmul.f32 %v344_v59, %v107_v7 }
 0x11a   :  { %v130_v11 = vpack.c.bf16 %v128_v9, %v127_v8 }
 0x11b   :  { %v112_v12 = vsel %vm111_vm11, %v344_v59, %v108_v10 }
 0x11c   :  { %318 = vmatmul.msk.bf16.vlgmr.msra.gmra.mxu0 %vm38_vm0, %v130_v11  ;;  %v115_v13 = vmul.f32 %v112_v12, %v429_v31 }
 0x11e   :  { %v122_v14 = vmul.f32 %v334_v61, %v115_v13 }
 0x120   :  { %v129_v15 = vadd.f32 %v335_v4, %v122_v14 }
 0x122   :  { %v131_v16 = vpack.c.bf16 %v129_v15, %v129_v15 }
 0x124   :  { %319 = vmatmul.msk.bf16.vlgmr.msra.gmra.mxu1 %vm38_vm0, %v131_v16 }
 0x199   :  { %v167_v18 = vpop.f32.mrf.mxu0 }
 0x19a   :  { %v453_v19 = vadd.f32 %v336_v17, %v167_v18 }
 0x19c   :  { %v456_v20 = vmul.f32 0.70710677, %v453_v19 }
 0x19e   :  { %v182_v21 = vand.u32 2147483647, %v456_v20  ;;  %vm281_vm8 = vcmp.ge.f32.partialorder %v456_v20, 0.0 }
 0x1a0   :  { %v185_v22 = vmul.f32 0.3275911, %v182_v21  ;;  %v263_v45 = vsub.f32 0.0, %v182_v21 }
 0x1a1   :  { %v169_v23 = vpop.f32.mrf.mxu0  ;;  %v172_v24 = vpop.f32.mrf.mxu1 }
 0x1a2   :  { %v188_v25 = vadd.f32 1.0, %v185_v22  ;;  %v459_v26 = vadd.f32 %v336_v17, %v169_v23  ;;  %v461_v27 = vadd.f32 %v336_v17, %v172_v24  ;;  %v266_v53 = vmul.f32 %v263_v45, %v182_v21 }
 0x1a4   :  { %345 = vrcp.f32 %v188_v25  ;;  %v464_v28 = vmul.f32 0.70710677, %v459_v26  ;;  %v467_v29 = vmul.f32 0.70710677, %v461_v27  ;;  %v202_v40 = vand.u32 2147483648, %v188_v25 }
 0x1a5   :  { %v200_v42 = vand.u32 2147483647, %v188_v25  ;;  %vm196_vm13 = vweird.f32 %v188_v25  ;;  %v269_v0 = vmul.f32 1.442695, %v266_v53  ;;  %v178_v20 = vmul.f32 0.5, %v461_v27 }
 0x1a6   :  { %v470_v30 = vand.u32 2147483647, %v464_v28  ;;  %v473_v31 = vand.u32 2147483647, %v467_v29  ;;  %v203_v44 = vor.u32 1.1754944e-38, %v202_v40  ;;  %vm282_vm9 = vcmp.ge.f32.partialorder %v464_v28, 0.0 }
 0x1a7   :  { %vm201_vm15 = vcmp.eq.f32.partialorder %v200_v42, 8.507059e+37  ;;  %vm283_vm10 = vcmp.ge.f32.partialorder %v467_v29, 0.0 }
 0x1a8   :  { %v186_v32 = vmul.f32 0.3275911, %v470_v30  ;;  %v187_v35 = vmul.f32 0.3275911, %v473_v31  ;;  %v264_v6 = vsub.f32 0.0, %v470_v30  ;;  %v265_v13 = vsub.f32 0.0, %v473_v31 }
 0x1a9   :  { %v174_v33 = vpop.f32.mrf.mxu1 }
 0x1aa   :  { %v346_v34 = vpop.eup %345  ;;  %v189_v37 = vadd.f32 1.0, %v186_v32  ;;  %v190_v38 = vadd.f32 1.0, %v187_v35  ;;  %v267_v18 = vmul.f32 %v264_v6, %v470_v30  ;;  %v268_v23 = vmul.f32 %v265_v13, %v473_v31 }
 0x1ab   :  { %v192_v36 = vmul.f32 %v346_v34, %v188_v25  ;;  %vm197_vm12 = vweird.f32 %v346_v34 }
 0x1ac   :  { %347 = vrcp.f32 %v189_v37  ;;  %vm198_vm14 = vmor %vm196_vm13, %vm197_vm12  ;;  %v217_v56 = vand.u32 2147483648, %v189_v37  ;;  %v215_v59 = vand.u32 2147483647, %v189_v37  ;;  %v232_v60 = vand.u32 2147483648, %v190_v38 }
 0x1ad   :  { %v193_v39 = vsub.f32 1.0, %v192_v36  ;;  %349 = vrcp.f32 %v190_v38  ;;  %v230_v63 = vand.u32 2147483647, %v190_v38  ;;  %vm211_vm2 = vweird.f32 %v189_v37 }
 0x1ae   :  { %v218_v3 = vor.u32 1.1754944e-38, %v217_v56  ;;  %vm226_vm4 = vweird.f32 %v190_v38  ;;  %vm216_vm5 = vcmp.eq.f32.partialorder %v215_v59, 8.507059e+37  ;;  %v233_v7 = vor.u32 1.1754944e-38, %v232_v60 }
 0x1af   :  { %v194_v41 = vmul.f32 %v346_v34, %v193_v39  ;;  %vm231_vm7 = vcmp.eq.f32.partialorder %v230_v63, 8.507059e+37  ;;  %351 = vpow2.f32 %v269_v0  ;;  %v176_v60 = vmul.f32 0.5, %v453_v19 }
 0x1b1   :  { %v195_v43 = vadd.f32 %v346_v34, %v194_v41 }
 0x1b2   :  { %v348_v46 = vpop.eup %347 }
 0x1b3   :  { %v199_v47 = vsel %vm198_vm14, %v346_v34, %v195_v43  ;;  %v350_v48 = vpop.eup %349  ;;  %v207_v50 = vmul.f32 %v348_v46, %v189_v37  ;;  %vm212_vm0 = vweird.f32 %v348_v46  ;;  %v271_v34 = vmul.f32 1.442695, %v267_v18 }
 0x1b4   :  { %v204_v49 = vsel %vm201_vm15, %v203_v44, %v199_v47  ;;  %v222_v52 = vmul.f32 %v350_v48, %v190_v38  ;;  %vm227_vm1 = vweird.f32 %v350_v48  ;;  %vm213_vm3 = vmor %vm211_vm2, %vm212_vm0  ;;  %v273_v38 = vmul.f32 1.442695, %v268_v23 }
 0x1b5   :  { %v236_v51 = vmul.f32 1.0614054, %v204_v49  ;;  %v208_v54 = vsub.f32 1.0, %v207_v50  ;;  %vm228_vm6 = vmor %vm226_vm4, %vm227_vm1  ;;  %v352_v36 = vpop.eup %351  ;;  %353 = vpow2.f32 %v271_v34 }
 0x1b6   :  { %v223_v57 = vsub.f32 1.0, %v222_v52  ;;  %355 = vpow2.f32 %v273_v38 }
 0x1b7   :  { %v239_v55 = vadd.f32 -1.4531521, %v236_v51  ;;  %v209_v58 = vmul.f32 %v348_v46, %v208_v54 }
 0x1b8   :  { %v224_v62 = vmul.f32 %v350_v48, %v223_v57 }
 0x1b9   :  { %v242_v61 = vmul.f32 %v239_v55, %v204_v49  ;;  %v210_v1 = vadd.f32 %v348_v46, %v209_v58 }
 0x1ba   :  { %v225_v4 = vadd.f32 %v350_v48, %v224_v62 }
 0x1bb   :  { %v245_v2 = vadd.f32 1.4214138, %v242_v61  ;;  %v214_v5 = vsel %vm213_vm3, %v348_v46, %v210_v1  ;;  %v177_v61 = vmul.f32 0.5, %v459_v26 }
 0x1bc   :  { %v219_v9 = vsel %vm216_vm5, %v218_v3, %v214_v5  ;;  %v229_v10 = vsel %vm228_vm6, %v350_v48, %v225_v4  ;;  %v354_v48 = vpop.eup %353 }
 0x1bd   :  { %v248_v8 = vmul.f32 %v245_v2, %v204_v49  ;;  %v237_v11 = vmul.f32 1.0614054, %v219_v9  ;;  %v234_v12 = vsel %vm231_vm7, %v233_v7, %v229_v10  ;;  %v356_v50 = vpop.eup %355 }
 0x1be   :  { %v238_v15 = vmul.f32 1.0614054, %v234_v12 }
 0x1bf   :  { %v251_v14 = vadd.f32 -0.28449672, %v248_v8  ;;  %v240_v16 = vadd.f32 -1.4531521, %v237_v11 }
 0x1c0   :  { %v241_v21 = vadd.f32 -1.4531521, %v238_v15 }
 0x1c1   :  { %v254_v17 = vmul.f32 %v251_v14, %v204_v49  ;;  %v243_v22 = vmul.f32 %v240_v16, %v219_v9 }
 0x1c2   :  { %v244_v25 = vmul.f32 %v241_v21, %v234_v12 }
 0x1c3   :  { %v257_v24 = vadd.f32 0.2548296, %v254_v17  ;;  %v246_v32 = vadd.f32 1.4214138, %v243_v22 }
 0x1c4   :  { %v247_v35 = vadd.f32 1.4214138, %v244_v25 }
 0x1c5   :  { %v260_v33 = vmul.f32 %v257_v24, %v204_v49  ;;  %v249_v37 = vmul.f32 %v246_v32, %v219_v9 }
 0x1c6   :  { %v250_v40 = vmul.f32 %v247_v35, %v234_v12 }
 0x1c7   :  { %v275_v39 = vmul.f32 %v352_v36, %v260_v33  ;;  %v252_v41 = vadd.f32 -0.28449672, %v249_v37 }
 0x1c8   :  { %v253_v42 = vadd.f32 -0.28449672, %v250_v40 }
 0x1c9   :  { %v278_v43 = vsub.f32 1.0, %v275_v39  ;;  %v255_v30 = vmul.f32 %v252_v41, %v219_v9 }
 0x1ca   :  { %v256_v44 = vmul.f32 %v253_v42, %v234_v12 }
 0x1cb   :  { %v258_v45 = vadd.f32 0.2548296, %v255_v30  ;;  %v284_v46 = vsub.f32 0.0, %v278_v43 }
 0x1cc   :  { %v259_v31 = vadd.f32 0.2548296, %v256_v44 }
 0x1cd   :  { %v261_v47 = vmul.f32 %v258_v45, %v219_v9  ;;  %v287_v53 = vsel %vm281_vm8, %v278_v43, %v284_v46 }
 0x1ce   :  { %v262_v49 = vmul.f32 %v259_v31, %v234_v12  ;;  %v290_v57 = vadd.f32 1.0, %v287_v53 }
 0x1cf   :  { %v276_v51 = vmul.f32 %v354_v48, %v261_v47 }
 0x1d0   :  { %v277_v52 = vmul.f32 %v356_v50, %v262_v49  ;;  %v293_v1 = vmul.f32 %v290_v57, %v176_v60 }
 0x1d1   :  { %v279_v54 = vsub.f32 1.0, %v276_v51 }
 0x1d2   :  { %v280_v55 = vsub.f32 1.0, %v277_v52 }
 0x1d3   :  { %v285_v56 = vsub.f32 0.0, %v279_v54 }
 0x1d4   :  { %v286_v58 = vsub.f32 0.0, %v280_v55 }
 0x1d5   :  { %v288_v59 = vsel %vm282_vm9, %v279_v54, %v285_v56 }
 0x1d6   :  { %v291_v62 = vadd.f32 1.0, %v288_v59  ;;  %v289_v63 = vsel %vm283_vm10, %v280_v55, %v286_v58 }
 0x1d7   :  { %v292_v0 = vadd.f32 1.0, %v289_v63 }
 0x1d8   :  { %v294_v2 = vmul.f32 %v291_v62, %v177_v61 }
 0x1d9   :  { %v295_v3 = vmul.f32 %v292_v0, %v178_v20 }
 0x1da   :  { %v329_v4 = vpack.c.bf16 %v294_v2, %v293_v1 }
 0x1db   :  { %v298_v5 = vpack.c.bf16 %v295_v3, %v295_v3 }
 0x1dc   :  { %330 = vst [vmem:[%s500_s7] sm:$0xff] %v329_v4  }
 0x1dd   :  { %301 = vst [vmem:[%s500_s7 + $0x8] sm:$0x1] %v298_v5 }

// kernel: transformer_forward.15
= control target key start
LH: loop header
LB: loop body
LE: loop exit
PB: predicated region body
PF: predicated region fallthrough
CT: control target
= control target key end

     0   :  { %vm18_vm0 = vcmask 261120   ;;  %v209_v2 = vmov 0.0   ;;  %vm21_vm1 = vcmask 254976   ;;  %vm145_vm2 = vcmask 257024   ;;  %s276_s1 = inlined_call_operand.vmem [shape: bf16[128,32], index: 1, kind: input, shape index: {}]   ;;  %s277_s2 = inlined_call_operand.vmem [shape: f32[1,32], index: 2, kind: input, shape index: {}]   ;;  %s278_s0 = inlined_call_operand.vmem [shape: bf16[18,128], index: 0, kind: input, shape index: {}]   ;;  %s279_s3 = inlined_call_operand.vmem [shape: bf16[18,32], index: 3, kind: output, shape index: {}]  }
   0x1   :  { %v198_v0 = vld [vmem:[%s276_s1 + $0x38] sm:$0xff]  ;;  %v197_v1 = vld [vmem:[%s276_s1 + $0x30] sm:$0xff]  ;;  %19 = vst.msk [vmem:[#allocation2] sm:$0xff] %vm18_vm0, %v209_v2  ;;  %v196_v3 = vld [vmem:[%s276_s1 + $0x28] sm:$0xff]  ;;  %vm148_vm3 = vcmask 253952  }
   0x2   :  { %103 = vmatpush.bf16.msra.mxu0 %v198_v0  ;;  %199 = vmatpush.bf16.msra.mxu1 %v198_v0  ;;  %20 = vst.msk [vmem:[#allocation2 + $0x8] sm:$0xff] %vm18_vm0, %v209_v2  ;;  %v195_v4 = vld [vmem:[%s276_s1 + $0x20] sm:$0xff]  ;;  %v194_v5 = vld [vmem:[%s276_s1 + $0x18] sm:$0xff]  ;;  %v193_v6 = vld [vmem:[%s276_s1 + $0x10] sm:$0xff] }
   0x3   :  { %v192_v7 = vld [vmem:[%s276_s1 + $0x8] sm:$0xff]  ;;  %v191_v10 = vld [vmem:[%s276_s1] sm:$0xff]  ;;  %22 = vst.msk [vmem:[#allocation2 + $0x10] sm:$0x3] %vm21_vm1, %v209_v2 }
   0x4   :  { %v28_v8 = vld [vmem:[%s278_s0 + $0x8] sm:$0x1]  ;;  %v190_v11 = vld [vmem:[%s278_s0] sm:$0xff] }
   0x5   :  { %v50_v9 = vunpack.c.l.b16 %v28_v8  ;;  %v208_v20 = vld [vmem:[%s277_s2] ss:$0 sm:$0xff] }
   0x6   :  { %104 = vmatpush.bf16.msra.mxu0 %v197_v1  ;;  %200 = vmatpush.bf16.msra.mxu1 %v197_v1 }
   0x7   :  { %v52_v12 = vpack.c.b16 %v50_v9, %v50_v9 }
   0x8   :  { %v23_v13 = vld [vmem:[#allocation2] sm:$0xff] }
   0x9   :  { %v24_v19 = vld [vmem:[#allocation2 + $0x8] sm:$0xff] }
   0xa   :  { %105 = vmatpush.bf16.msra.mxu0 %v196_v3  ;;  %201 = vmatpush.bf16.msra.mxu1 %v196_v3  ;;  %v25_v14 = vld [vmem:[#allocation2 + $0x10] sm:$0x3] }
   0xe   :  { %106 = vmatpush.bf16.msra.mxu0 %v195_v4  ;;  %202 = vmatpush.bf16.msra.mxu1 %v195_v4 }
  0x12   :  { %107 = vmatpush.bf16.msra.mxu0 %v194_v5  ;;  %203 = vmatpush.bf16.msra.mxu1 %v194_v5 }
  0x16   :  { %108 = vmatpush.bf16.msra.mxu0 %v193_v6  ;;  %204 = vmatpush.bf16.msra.mxu1 %v193_v6 }
  0x1a   :  { %109 = vmatpush.bf16.msra.mxu0 %v192_v7  ;;  %205 = vmatpush.bf16.msra.mxu1 %v192_v7 }
  0x1e   :  { %110 = vmatpush.bf16.msra.mxu0 %v191_v10  ;;  %206 = vmatpush.bf16.msra.mxu1 %v191_v10 }
  0x21   :  { %111 = vmatmul.bf16.vlgmr.msra.gmra.mxu0 %v190_v11  ;;  %116 = vmatmul.bf16.vlgmr.msra.gmra.mxu1 %v52_v12 }
  0x9e   :  { %v112_v15 = vpop.f32.mrf.mxu0  ;;  %v117_v16 = vpop.f32.mrf.mxu1 }
  0x9f   :  { %v121_v17 = vadd.f32 %v112_v15, %v23_v13  ;;  %v123_v18 = vadd.f32 %v117_v16, %v25_v14 }
  0xa1   :  { %125 = vst.msk [vmem:[#allocation2] sm:$0xff] %vm18_vm0, %v121_v17 }
  0xa2   :  { %128 = vst.msk [vmem:[#allocation2 + $0x10] sm:$0x3] %vm21_vm1, %v123_v18 }
  0xa6   :  { %v114_v21 = vpop.f32.mrf.mxu0  ;;  %v119_v22 = vpop.f32.mrf.mxu1 }
  0xa7   :  { %v122_v23 = vadd.f32 %v114_v21, %v24_v19 }
  0xa8   :  { %v132_v24 = vld [vmem:[#allocation2] sm:$0xff] }
  0xa9   :  { %v139_v25 = vadd.f32 %v208_v20, %v132_v24  ;;  %v134_v26 = vld [vmem:[#allocation2 + $0x10] sm:$0x3]  ;;  %126 = vst.msk [vmem:[#allocation2 + $0x8] sm:$0xff] %vm18_vm0, %v122_v23 }
  0xaa   :  { %v141_v27 = vadd.f32 %v208_v20, %v134_v26 }
  0xab   :  { %v142_v28 = vpack.c.bf16 %v139_v25, %v139_v25 }
  0xac   :  { %v144_v29 = vpack.c.bf16 %v141_v27, %v141_v27 }
  0xad   :  { %146 = vst.msk [vmem:[%s279_s3] sm:$0xf] %vm145_vm2, %v142_v28 }
  0xae   :  { %149 = vst.msk [vmem:[%s279_s3 + $0x8] sm:$0x1] %vm148_vm3, %v144_v29 }
  0xb0   :  { %v133_v30 = vld [vmem:[#allocation2 + $0x8] sm:$0xff] }
  0xb1   :  { %v140_v31 = vadd.f32 %v208_v20, %v133_v30 }
  0xb3   :  { %v143_v32 = vpack.c.bf16 %v140_v31, %v140_v31 }
  0xb5   :  { %147 = vst.msk [vmem:[%s279_s3 + $0x4] sm:$0xf] %vm145_vm2, %v143_v32 }

// kernel: transformer_forward.21
= control target key start
LH: loop header
LB: loop body
LE: loop exit
PB: predicated region body
PF: predicated region fallthrough
CT: control target
= control target key end

     0   :  { %vm29_vm0 = vcmask 261120   ;;  %vm36_vm1 = vcmask 254976   ;;  %v140_v14 = vmov 32.0   ;;  %s205_s0 = inlined_call_operand.vmem [shape: bf16[18,32], index: 0, kind: input, shape index: {}]   ;;  %s206_s1 = inlined_call_operand.vmem [shape: f32[18,32], index: 1, kind: input, shape index: {}]   ;;  %s207_s2 = inlined_call_operand.vmem [shape: f32[1,32], index: 2, kind: input, shape index: {}]   ;;  %s208_s3 = inlined_call_operand.vmem [shape: f32[1,32], index: 3, kind: input, shape index: {}]   ;;  %s209_s4 = inlined_call_operand.vmem [shape: f32[18,32], index: 4, kind: output, shape index: {}]  }
   0x1   :  { %v126_v0 = vld [vmem:[%s205_s0] sm:$0xff]   ;;  %v19_v3 = vld [vmem:[%s205_s0 + $0x8] sm:$0x1]  ;;  %v25_v4 = vld [vmem:[%s206_s1 + $0x10] sm:$0x3]  ;;  %132 = vrcp.f32 %v140_v14 }
   0x2   :  { %v23_v1 = vld [vmem:[%s206_s1] sm:$0xff]  ;;  %v127_v2 = vunpack.c.l.bf16 %v126_v0  ;;  %v22_v5 = vunpack.c.l.bf16 %v19_v3  ;;  %v128_v7 = vunpack.c.h.bf16 %v126_v0  ;;  %v24_v8 = vld [vmem:[%s206_s1 + $0x8] sm:$0xff] }
   0x3   :  { %v130_v53 = vld [vmem:[%s207_s2] ss:$0 sm:$0xff] }
   0x4   :  { %v26_v6 = vadd.f32 %v127_v2, %v23_v1  ;;  %v28_v9 = vadd.f32 %v25_v4, %v22_v5  ;;  %v27_v12 = vadd.f32 %v128_v7, %v24_v8  ;;  %v131_v56 = vld [vmem:[%s208_s3] ss:$0 sm:$0xff] }
   0x6   :  { %v30_v10 = vsel %vm29_vm0, %v26_v6, 0.0  ;;  %v37_v11 = vsel %vm36_vm1, %v28_v9, 0.0  ;;  %v33_v13 = vsel %vm29_vm0, %v27_v12, 0.0 }
   0x7   :  { %31 = vadd.xlane.f32.xlu0 %v30_v10  ;;  %38 = vadd.xlane.f32.xlu1 %v37_v11  ;;  %v133_v15 = vpop.eup %132 }
   0x8   :  { %v41_v16 = vmul.f32 32.0, %v133_v15  ;;  %vm45_vm2 = vweird.f32 %v133_v15 }
   0xa   :  { %v42_v17 = vsub.f32 1.0, %v41_v16 }
   0xc   :  { %v43_v18 = vmul.f32 %v133_v15, %v42_v17 }
   0xe   :  { %v44_v19 = vadd.f32 %v133_v15, %v43_v18 }
   0xf   :  { %34 = vadd.xlane.f32.xlu0 %v33_v13 }
  0x10   :  { %v46_v20 = vsel %vm45_vm2, %v133_v15, %v44_v19 }
  0x7a   :  { %v32_v21 = vpop.xlane.xlu0 %31  ;;  %v39_v25 = vpop.xlane.xlu1 %38 }
  0x7b   :  { %v47_v22 = vmul.f32 %v46_v20, %v32_v21  ;;  %v49_v29 = vmul.f32 %v46_v20, %v39_v25 }
  0x7d   :  { %v50_v23 = vsub.f32 %v26_v6, %v47_v22  ;;  %v52_v31 = vsub.f32 %v28_v9, %v49_v29 }
  0x7f   :  { %v53_v24 = vmul.f32 %v50_v23, %v50_v23  ;;  %v55_v34 = vmul.f32 %v52_v31, %v52_v31 }
  0x81   :  { %v56_v26 = vsel %vm29_vm0, %v53_v24, 0.0  ;;  %v62_v35 = vsel %vm36_vm1, %v55_v34, 0.0 }
  0x82   :  { %57 = vadd.xlane.f32.xlu1 %v56_v26  ;;  %v35_v27 = vpop.xlane.xlu0 %34 }
  0x83   :  { %v48_v28 = vmul.f32 %v46_v20, %v35_v27 }
  0x85   :  { %v51_v30 = vsub.f32 %v27_v12, %v48_v28 }
  0x87   :  { %v54_v32 = vmul.f32 %v51_v30, %v51_v30 }
  0x89   :  { %v59_v33 = vsel %vm29_vm0, %v54_v32, 0.0 }
  0x8a   :  { %60 = vadd.xlane.f32.xlu2 %v59_v33 }
  0x92   :  { %63 = vadd.xlane.f32.xlu2 %v62_v35 }
  0xf5   :  { %v58_v36 = vpop.xlane.xlu1 %57 }
  0xf6   :  { %v65_v37 = vmul.f32 %v58_v36, %v46_v20 }
  0xf8   :  { %v68_v38 = vadd.f32 1e-06, %v65_v37 }
  0xfa   :  { %134 = vrsqrt.f32 %v68_v38  ;;  %vm77_vm4 = vweird.f32 %v68_v38 }
  0xfd   :  { %v61_v39 = vpop.xlane.xlu2 %60 }
  0xfe   :  { %v66_v40 = vmul.f32 %v61_v39, %v46_v20 }
 0x100   :  { %v135_v41 = vpop.eup %134  ;;  %v69_v42 = vadd.f32 1e-06, %v66_v40 }
 0x101   :  { %v72_v43 = vmul.f32 %v135_v41, %v68_v38  ;;  %vm78_vm3 = vweird.f32 %v135_v41 }
 0x102   :  { %136 = vrsqrt.f32 %v69_v42  ;;  %vm79_vm5 = vmor %vm77_vm4, %vm78_vm3  ;;  %vm87_vm7 = vweird.f32 %v69_v42 }
 0x103   :  { %v73_v44 = vmul.f32 %v135_v41, %v72_v43 }
 0x105   :  { %v74_v45 = vmul.f32 0.5, %v73_v44  ;;  %v64_v46 = vpop.xlane.xlu2 %63 }
 0x106   :  { %v67_v47 = vmul.f32 %v64_v46, %v46_v20 }
 0x107   :  { %v75_v48 = vsub.f32 1.5, %v74_v45 }
 0x108   :  { %v137_v49 = vpop.eup %136  ;;  %v70_v50 = vadd.f32 1e-06, %v67_v47 }
 0x109   :  { %v76_v51 = vmul.f32 %v135_v41, %v75_v48  ;;  %v82_v52 = vmul.f32 %v137_v49, %v69_v42  ;;  %vm88_vm6 = vweird.f32 %v137_v49 }
 0x10a   :  { %138 = vrsqrt.f32 %v70_v50  ;;  %vm89_vm8 = vmor %vm87_vm7, %vm88_vm6  ;;  %vm97_vm10 = vweird.f32 %v70_v50 }
 0x10b   :  { %v80_v54 = vsel %vm79_vm5, %v135_v41, %v76_v51  ;;  %v83_v55 = vmul.f32 %v137_v49, %v82_v52 }
 0x10c   :  { %v101_v57 = vmul.f32 %v80_v54, %v50_v23 }
 0x10d   :  { %v84_v58 = vmul.f32 0.5, %v83_v55 }
 0x10e   :  { %v108_v59 = vmul.f32 %v130_v53, %v101_v57 }
 0x10f   :  { %v85_v60 = vsub.f32 1.5, %v84_v58 }
 0x110   :  { %v139_v61 = vpop.eup %138  ;;  %v115_v62 = vadd.f32 %v131_v56, %v108_v59 }
 0x111   :  { %v86_v63 = vmul.f32 %v137_v49, %v85_v60  ;;  %v92_v0 = vmul.f32 %v139_v61, %v70_v50  ;;  %vm98_vm9 = vweird.f32 %v139_v61 }
 0x112   :  { %118 = vst.msk [vmem:[%s209_s4] sm:$0xff] %vm29_vm0, %v115_v62  ;;  %vm99_vm11 = vmor %vm97_vm10, %vm98_vm9 }
 0x113   :  { %v90_v1 = vsel %vm89_vm8, %v137_v49, %v86_v63  ;;  %v93_v2 = vmul.f32 %v139_v61, %v92_v0 }
 0x114   :  { %v102_v3 = vmul.f32 %v90_v1, %v51_v30 }
 0x115   :  { %v94_v4 = vmul.f32 0.5, %v93_v2 }
 0x116   :  { %v109_v5 = vmul.f32 %v130_v53, %v102_v3 }
 0x117   :  { %v95_v6 = vsub.f32 1.5, %v94_v4 }
 0x118   :  { %v116_v7 = vadd.f32 %v131_v56, %v109_v5 }
 0x119   :  { %v96_v8 = vmul.f32 %v139_v61, %v95_v6 }
 0x11a   :  { %119 = vst.msk [vmem:[%s209_s4 + $0x8] sm:$0xff] %vm29_vm0, %v116_v7 }
 0x11b   :  { %v100_v9 = vsel %vm99_vm11, %v139_v61, %v96_v8 }
 0x11c   :  { %v103_v10 = vmul.f32 %v100_v9, %v52_v31 }
 0x11e   :  { %v110_v11 = vmul.f32 %v130_v53, %v103_v10 }
 0x120   :  { %v117_v12 = vadd.f32 %v131_v56, %v110_v11 }
 0x122   :  { %120 = vst.msk [vmem:[%s209_s4 + $0x10] sm:$0x3] %vm36_vm1, %v117_v12 }

</bundles_post_ra>
